<compile_context>
chip_gen: v7x
topology: tpu7x:2x2x1
jax: 0.10.0
libtpu: 0.0.40
codegen_flags: <defaults>
</compile_context>

<pallas_src>
import jax
import jax.numpy as jnp
from jax.experimental import pallas as pl
from jax.experimental.pallas import tpu as pltpu

_LANE = 128
_SUBLANE = 8
_EPS = 1e-5


def _round_up(n, m):
    return ((n + m - 1) // m) * m


def _pad_axis(a, target, axis):
    pad = target - a.shape[axis]
    if pad == 0:
        return a
    widths = [(0, 0)] * a.ndim
    widths[axis] = (0, pad)
    return jnp.pad(a, widths)


def _choose_tm(n_rows, tm_max):
    """Row-tile size: multiple of 8; >=2 tiles when the batch allows (v7x megacore);
    for big batches, the largest candidate keeping padding waste <= ~12.5%."""
    tm_max = max(_SUBLANE, (int(tm_max) // _SUBLANE) * _SUBLANE)
    n8 = _round_up(n_rows, _SUBLANE)
    if n8 <= tm_max:
        # Whole batch fits in one tile: split it in two (when it splits cleanly) so both
        # v7x TensorCores get a tile; costs nothing on single-TC v5e/v6e.
        return n8 // 2 if (n8 >= 2 * _SUBLANE and n8 % (2 * _SUBLANE) == 0) else n8
    budget = n8 + max(n8 // 8, _SUBLANE)  # allow <= ~12.5% padded rows
    for cand in (1024, 512, 384, 256, 192, 128, 96, 64, 32, 16, 8):
        if cand <= tm_max and _round_up(n_rows, cand) <= budget:
            return cand
    return _SUBLANE


def _vmem_physical_bytes():
    try:
        return int(pltpu.get_tpu_info().vmem_capacity_bytes)
    except Exception:
        return 64 << 20  # conservative: v7x per-TensorCore VMEM


def fc_kernel(scalars_ref,        # SMEM (3,): [alpha1, alpha2, 1 - coeff]
              x_ref,              # (TM, Din_p)  f32 row tile of the input
              w1_ref, t1_ref,     # (Din_p, H1_p) [f32|bf16], (1, H1_p) f32  BN-folded
              w2_ref, t2_ref,     # (H1_p,  H2_p),            (1, H2_p)
              w3_ref, b3_ref,     # (H2_p, Dout_p) coeff-folded, (1, Dout_p)
              o_ref):             # (TM, Dout_p) f32
    a1 = scalars_ref[0]
    a2 = scalars_ref[1]
    one_minus_coeff = scalars_ref[2]

    x = x_ref[...]                       # kept f32 for the exact residual mix
    cdt = w1_ref.dtype                   # compute dtype of the MXU operands

    # layer1: Linear with BN scale folded into the weight columns, bias/BN folded into t1.
    h1 = jnp.dot(x.astype(cdt), w1_ref[...],
                 preferred_element_type=jnp.float32) + t1_ref[...]
    h1 = jnp.where(h1 > 0, h1, a1 * h1)          # PReLU; drp1 is identity in eval mode.

    # layer2
    h2 = jnp.dot(h1.astype(cdt), w2_ref[...],
                 preferred_element_type=jnp.float32) + t2_ref[...]
    h2 = jnp.where(h2 > 0, h2, a2 * h2)          # PReLU; drp2 is identity in eval mode.

    # layer3 (coeff already folded into w3/b3 at parameter-prep time)
    y = jnp.dot(h2.astype(cdt), w3_ref[...],
                preferred_element_type=jnp.float32) + b3_ref[...]

    # Residual mix: out = coeff*Linear3(...) + (1-coeff)*x  (coeff rode the MXU above).
    o_ref[...] = y + one_minus_coeff * x


def fully_connected_forward(x, params, *, tm=512, use_bf16=False):
    """x: (N, in_dim) f32. params: dict of plain JAX arrays (see init_params).

    `tm` is the max row-tile size (clamped to a multiple of 8 and adapted to the batch).
    `use_bf16=True` casts the folded weight matrices (and matmul operands) to bfloat16
    for native MXU rate; accumulation stays f32 but rounding differs from the reference.
    """
    N, in_dim = x.shape
    hid1 = params["w1t"].shape[1]
    hid2 = params["w2t"].shape[1]
    out_dim = params["w3t"].shape[1]
    assert out_dim == in_dim, "residual coeff*y + (1-coeff)*x requires out_dim == in_dim"

    coeff = params["coeff"]

    # ---- fold Linear bias + BatchNorm1d (eval) into weights + per-feature shift ----
    def fold(wt, b, gamma, beta, mean, var):
        scale = gamma / jnp.sqrt(var + _EPS)          # per output feature
        w_eff = wt * scale[None, :]                   # fold scale into weight columns
        shift = (b - mean) * scale + beta
        return w_eff, shift[None, :]

    w1_eff, t1 = fold(params["w1t"], params["b1"], params["bn1_gamma"], params["bn1_beta"],
                      params["bn1_mean"], params["bn1_var"])
    w2_eff, t2 = fold(params["w2t"], params["b2"], params["bn2_gamma"], params["bn2_beta"],
                      params["bn2_mean"], params["bn2_var"])
    # Fold the residual coefficient into layer3 so the kernel epilogue is y + (1-coeff)*x.
    w3_eff = params["w3t"] * coeff
    b3 = (params["b3"] * coeff)[None, :]

    # ---- pad feature dims to multiples of 128 (lane-dense MXU feeds and stores) ----
    din_p = _round_up(in_dim, _LANE)
    h1_p = _round_up(hid1, _LANE)
    h2_p = _round_up(hid2, _LANE)
    dout_p = _round_up(out_dim, _LANE)

    x_p = _pad_axis(x, din_p, axis=1).astype(jnp.float32)
    w1_p = _pad_axis(_pad_axis(w1_eff, din_p, 0), h1_p, 1)
    t1_p = _pad_axis(t1, h1_p, 1).astype(jnp.float32)
    w2_p = _pad_axis(_pad_axis(w2_eff, h1_p, 0), h2_p, 1)
    t2_p = _pad_axis(t2, h2_p, 1).astype(jnp.float32)
    w3_p = _pad_axis(_pad_axis(w3_eff, h2_p, 0), dout_p, 1)
    b3_p = _pad_axis(b3, dout_p, 1).astype(jnp.float32)

    w_dtype = jnp.bfloat16 if use_bf16 else jnp.float32
    w1_p = w1_p.astype(w_dtype)
    w2_p = w2_p.astype(w_dtype)
    w3_p = w3_p.astype(w_dtype)

    # ---- adaptive row tiling: multiple of 8, minimal batch padding, >=2 tiles if possible ----
    tm_eff = _choose_tm(N, tm)
    n_pad = _round_up(N, tm_eff)
    x_p = _pad_axis(x_p, n_pad, axis=0)
    grid = (n_pad // tm_eff,)

    scalars = jnp.array([params["prelu1"], params["prelu2"], 1.0 - coeff], dtype=jnp.float32)

    # ---- VMEM budgeting ----
    w_isize = jnp.dtype(w_dtype).itemsize
    weight_bytes_1buf = (din_p * h1_p + h1_p * h2_p + h2_p * dout_p) * w_isize
    shift_bytes_1buf = _SUBLANE * (h1_p + h2_p + dout_p) * 4   # (1,H) blocks pad to 8 sublanes
    phys_vmem = _vmem_physical_bytes()
    # TODO(synk): if weight_bytes_1buf exceeds ~48 MiB (v7x 64 MiB/TC budget), fall back to a
    # K-tiled grid over the largest contraction (accumulate in VMEM scratch with pl.when
    # init/finalize) instead of keeping all three weights resident.

    def build(weight_buffers):
        resident_kwargs = {"pipeline_mode": pl.Buffered(1)} if weight_buffers == 1 else {}

        def resident(shape):   # constant index_map: weights/shifts stay VMEM-resident
            return pl.BlockSpec(shape, lambda i: (0, 0), **resident_kwargs)

        need = (weight_bytes_1buf + shift_bytes_1buf) * weight_buffers
        need += 2 * tm_eff * (din_p + dout_p) * 4               # double-buffered x / out tiles
        need += tm_eff * (din_p + h1_p + h2_p + dout_p) * 4     # live activations (upper bound)
        vmem_limit = min(max(int(1.25 * need) + (2 << 20), 32 << 20), int(phys_vmem * 0.85))

        return pl.pallas_call(
            fc_kernel,
            out_shape=jax.ShapeDtypeStruct((n_pad, dout_p), jnp.float32),
            grid_spec=pltpu.PrefetchScalarGridSpec(
                num_scalar_prefetch=0,
                grid=grid,
                in_specs=[
                    pl.BlockSpec(memory_space=pltpu.MemorySpace.SMEM),    # scalars
                    pl.BlockSpec((tm_eff, din_p), lambda i: (i, 0)),      # x row tile (streamed)
                    resident((din_p, h1_p)), resident((1, h1_p)),         # w1_eff, t1
                    resident((h1_p, h2_p)), resident((1, h2_p)),          # w2_eff, t2
                    resident((h2_p, dout_p)), resident((1, dout_p)),      # coeff*w3, coeff*b3
                ],
                out_specs=pl.BlockSpec((tm_eff, dout_p), lambda i: (i, 0)),
            ),
            compiler_params=pltpu.CompilerParams(
                dimension_semantics=("parallel",),
                vmem_limit_bytes=vmem_limit,
            ),
        )

    args = (scalars, x_p, w1_p, t1_p, w2_p, t2_p, w3_p, b3_p)
    try:
        out_p = build(1)(*args)     # single-buffered resident weights (preferred)
    except Exception:
        # Fallback if this JAX build rejects Buffered(1) for constant-index operands:
        # identical math, just 2x resident-weight VMEM.
        out_p = build(2)(*args)

    return out_p[:N, :out_dim]


def init_params(key, in_dim, hid1, hid2, out_dim, par):
    ks = jax.random.split(key, 12)
    p = {}
    # PyTorch nn.Linear stores weight as (out, in); we keep the transposed (in, out) copy.
    p["w1t"] = 0.1 * jax.random.normal(ks[0], (in_dim, hid1), jnp.float32)
    p["b1"] = 0.1 * jax.random.normal(ks[1], (hid1,), jnp.float32)
    p["w2t"] = 0.1 * jax.random.normal(ks[2], (hid1, hid2), jnp.float32)
    p["b2"] = 0.1 * jax.random.normal(ks[3], (hid2,), jnp.float32)
    p["w3t"] = 0.1 * jax.random.normal(ks[4], (hid2, out_dim), jnp.float32)
    p["b3"] = 0.1 * jax.random.normal(ks[5], (out_dim,), jnp.float32)
    # BatchNorm1d params + running stats (non-trivial so BN is not identity).
    p["bn1_gamma"] = 1.0 + 0.1 * jax.random.normal(ks[6], (hid1,), jnp.float32)
    p["bn1_beta"] = 0.1 * jax.random.normal(ks[7], (hid1,), jnp.float32)
    p["bn1_mean"] = 0.05 * jax.random.normal(ks[8], (hid1,), jnp.float32)
    p["bn1_var"] = 1.0 + 0.1 * jax.random.uniform(ks[9], (hid1,), jnp.float32)
    p["bn2_gamma"] = 1.0 + 0.1 * jax.random.normal(ks[10], (hid2,), jnp.float32)
    p["bn2_beta"] = 0.1 * jax.random.normal(ks[11], (hid2,), jnp.float32)
    p["bn2_mean"] = jnp.zeros((hid2,), jnp.float32)
    p["bn2_var"] = jnp.ones((hid2,), jnp.float32)
    # PReLU default init alpha = 0.25 (num_parameters=1 in nn.PReLU()).
    p["prelu1"] = jnp.float32(0.25)
    p["prelu2"] = jnp.float32(0.25)
    # coeff = nn.Parameter(torch.tensor([par]))
    p["coeff"] = jnp.float32(par)
    return p


def reference_forward(x, params):
    """Pure-JAX reference matching the PyTorch eval-mode forward."""
    def bn(h, g, b, m, v):
        return (h - m) / jnp.sqrt(v + _EPS) * g + b

    def prelu(h, a):
        return jnp.where(h > 0, h, a * h)

    h1 = x @ params["w1t"] + params["b1"]
    h1 = prelu(bn(h1, params["bn1_gamma"], params["bn1_beta"],
                  params["bn1_mean"], params["bn1_var"]), params["prelu1"])
    h2 = h1 @ params["w2t"] + params["b2"]
    h2 = prelu(bn(h2, params["bn2_gamma"], params["bn2_beta"],
                  params["bn2_mean"], params["bn2_var"]), params["prelu2"])
    y = h2 @ params["w3t"] + params["b3"]
    return params["coeff"] * y + (1.0 - params["coeff"]) * x


if __name__ == "__main__":
    # The residual `coeff*y + (1-coeff)*x` forces out_dim == in_dim.
    N, in_dim, hid1, hid2, out_dim = 64, 32, 64, 48, 32
    par = 0.7

    key = jax.random.PRNGKey(0)
    k_x, k_p = jax.random.split(key)
    x = jax.random.normal(k_x, (N, in_dim), jnp.float32)
    params = init_params(k_p, in_dim, hid1, hid2, out_dim, par)

    ref = reference_forward(x, params)

    # f32 path: exact (to fp rounding) parity with the PyTorch eval-mode forward.
    out = jax.block_until_ready(fully_connected_forward(x, params))
    assert out.shape == (N, out_dim)
    assert jnp.allclose(out, ref, atol=1e-4, rtol=1e-4), "f32 kernel mismatch vs reference"

    # bf16 weight path: native MXU rate, looser tolerance due to bf16 operand rounding.
    out_bf16 = jax.block_until_ready(fully_connected_forward(x, params, use_bf16=True))
    assert out_bf16.shape == (N, out_dim)
    assert jnp.allclose(out_bf16, ref, atol=5e-2, rtol=5e-2), "bf16 kernel mismatch vs reference"

    print("KERNEL_OK")
</pallas_src>

<mosaic_0001>
module attributes {stable_mosaic.version = 11 : i64} {
  func.func @fc_kernel(%arg0: i32, %arg1: memref<3xf32, #tpu.memory_space<smem>>, %arg2: memref<32x128xf32, #tpu.memory_space<vmem>>, %arg3: memref<128x128xf32, #tpu.memory_space<vmem>>, %arg4: memref<1x128xf32, #tpu.memory_space<vmem>>, %arg5: memref<128x128xf32, #tpu.memory_space<vmem>>, %arg6: memref<1x128xf32, #tpu.memory_space<vmem>>, %arg7: memref<128x128xf32, #tpu.memory_space<vmem>>, %arg8: memref<1x128xf32, #tpu.memory_space<vmem>>, %arg9: memref<32x128xf32, #tpu.memory_space<vmem>>) attributes {dimension_semantics = [#tpu.dimension_semantics<parallel>], iteration_bounds = array<i64: 2>, scalar_prefetch = 0 : i64, scratch_operands = 0 : i64, tpu.core_type = #tpu.core_type<tc>, window_params = [{transform_indices = @transform_0, window_bounds = array<i64: 3>}, {transform_indices = @transform_1, window_bounds = array<i64: 32, 128>}, {pipeline_mode = #tpu.pipeline_mode<synchronous>, transform_indices = @transform_2, window_bounds = array<i64: 128, 128>}, {pipeline_mode = #tpu.pipeline_mode<synchronous>, transform_indices = @transform_3, window_bounds = array<i64: 1, 128>}, {pipeline_mode = #tpu.pipeline_mode<synchronous>, transform_indices = @transform_4, window_bounds = array<i64: 128, 128>}, {pipeline_mode = #tpu.pipeline_mode<synchronous>, transform_indices = @transform_5, window_bounds = array<i64: 1, 128>}, {pipeline_mode = #tpu.pipeline_mode<synchronous>, transform_indices = @transform_6, window_bounds = array<i64: 128, 128>}, {pipeline_mode = #tpu.pipeline_mode<synchronous>, transform_indices = @transform_7, window_bounds = array<i64: 1, 128>}, {transform_indices = @transform_8, window_bounds = array<i64: 32, 128>}]} {
    %c0 = arith.constant 0 : index
    %0 = memref.load %arg1[%c0] : memref<3xf32, #tpu.memory_space<smem>>
    %c1 = arith.constant 1 : index
    %1 = memref.load %arg1[%c1] : memref<3xf32, #tpu.memory_space<smem>>
    %c2 = arith.constant 2 : index
    %2 = memref.load %arg1[%c2] : memref<3xf32, #tpu.memory_space<smem>>
    %c0_0 = arith.constant 0 : index
    %c0_1 = arith.constant 0 : index
    %3 = vector.load %arg2[%c0_0, %c0_1] : memref<32x128xf32, #tpu.memory_space<vmem>>, vector<32x128xf32>
    %c0_2 = arith.constant 0 : index
    %c0_3 = arith.constant 0 : index
    %4 = vector.load %arg3[%c0_2, %c0_3] : memref<128x128xf32, #tpu.memory_space<vmem>>, vector<128x128xf32>
    %cst = arith.constant dense<0.000000e+00> : vector<32x128xf32>
    %5 = tpu.matmul %3, %4, %cst {dimension_numbers = #tpu.dot_dimension_numbers<[1], [0], [0], [1], [0, 0, 1, 1], [], []>} : vector<32x128xf32>, vector<128x128xf32>, vector<32x128xf32> -> vector<32x128xf32>
    %c0_4 = arith.constant 0 : index
    %c0_5 = arith.constant 0 : index
    %6 = vector.load %arg4[%c0_4, %c0_5] : memref<1x128xf32, #tpu.memory_space<vmem>>, vector<1x128xf32>
    %7 = vector.broadcast %6 : vector<1x128xf32> to vector<32x128xf32>
    %8 = arith.addf %5, %7 : vector<32x128xf32>
    %cst_6 = arith.constant 0.000000e+00 : f32
    %9 = vector.broadcast %cst_6 : f32 to vector<32x128xf32>
    %10 = arith.cmpf ogt, %8, %9 : vector<32x128xf32>
    %11 = vector.broadcast %0 : f32 to vector<32x128xf32>
    %12 = arith.mulf %11, %8 : vector<32x128xf32>
    %13 = arith.select %10, %8, %12 : vector<32x128xi1>, vector<32x128xf32>
    %c0_7 = arith.constant 0 : index
    %c0_8 = arith.constant 0 : index
    %14 = vector.load %arg5[%c0_7, %c0_8] : memref<128x128xf32, #tpu.memory_space<vmem>>, vector<128x128xf32>
    %cst_9 = arith.constant dense<0.000000e+00> : vector<32x128xf32>
    %15 = tpu.matmul %13, %14, %cst_9 {dimension_numbers = #tpu.dot_dimension_numbers<[1], [0], [0], [1], [0, 0, 1, 1], [], []>} : vector<32x128xf32>, vector<128x128xf32>, vector<32x128xf32> -> vector<32x128xf32>
    %c0_10 = arith.constant 0 : index
    %c0_11 = arith.constant 0 : index
    %16 = vector.load %arg6[%c0_10, %c0_11] : memref<1x128xf32, #tpu.memory_space<vmem>>, vector<1x128xf32>
    %17 = vector.broadcast %16 : vector<1x128xf32> to vector<32x128xf32>
    %18 = arith.addf %15, %17 : vector<32x128xf32>
    %cst_12 = arith.constant 0.000000e+00 : f32
    %19 = vector.broadcast %cst_12 : f32 to vector<32x128xf32>
    %20 = arith.cmpf ogt, %18, %19 : vector<32x128xf32>
    %21 = vector.broadcast %1 : f32 to vector<32x128xf32>
    %22 = arith.mulf %21, %18 : vector<32x128xf32>
    %23 = arith.select %20, %18, %22 : vector<32x128xi1>, vector<32x128xf32>
    %c0_13 = arith.constant 0 : index
    %c0_14 = arith.constant 0 : index
    %24 = vector.load %arg7[%c0_13, %c0_14] : memref<128x128xf32, #tpu.memory_space<vmem>>, vector<128x128xf32>
    %cst_15 = arith.constant dense<0.000000e+00> : vector<32x128xf32>
    %25 = tpu.matmul %23, %24, %cst_15 {dimension_numbers = #tpu.dot_dimension_numbers<[1], [0], [0], [1], [0, 0, 1, 1], [], []>} : vector<32x128xf32>, vector<128x128xf32>, vector<32x128xf32> -> vector<32x128xf32>
    %c0_16 = arith.constant 0 : index
    %c0_17 = arith.constant 0 : index
    %26 = vector.load %arg8[%c0_16, %c0_17] : memref<1x128xf32, #tpu.memory_space<vmem>>, vector<1x128xf32>
    %27 = vector.broadcast %26 : vector<1x128xf32> to vector<32x128xf32>
    %28 = arith.addf %25, %27 : vector<32x128xf32>
    %29 = vector.broadcast %2 : f32 to vector<32x128xf32>
    %30 = arith.mulf %29, %3 : vector<32x128xf32>
    %31 = arith.addf %28, %30 : vector<32x128xf32>
    %c0_18 = arith.constant 0 : index
    %c0_19 = arith.constant 0 : index
    %32 = vector.load %arg9[%c0_18, %c0_19] : memref<32x128xf32, #tpu.memory_space<vmem>>, vector<32x128xf32>
    tpu.vector_store %arg9[%c0_18, %c0_19], %31 {strides = array<i32>} : memref<32x128xf32, #tpu.memory_space<vmem>>, vector<32x128xf32>,
    return
  }
  func.func @transform_0(%arg0: i32) -> i32 {
    %c0_i32 = arith.constant 0 : i32
    %c0_i32_0 = arith.constant 0 : i32
    return %c0_i32 : i32
  }
  func.func @transform_1(%arg0: i32) -> (i32, i32) {
    %c0_i32 = arith.constant 0 : i32
    %c0_i32_0 = arith.constant 0 : i32
    return %arg0, %c0_i32 : i32, i32
  }
  func.func @transform_2(%arg0: i32) -> (i32, i32) {
    %c0_i32 = arith.constant 0 : i32
    %c0_i32_0 = arith.constant 0 : i32
    %c0_i32_1 = arith.constant 0 : i32
    return %c0_i32, %c0_i32_0 : i32, i32
  }
  func.func @transform_3(%arg0: i32) -> (i32, i32) {
    %c0_i32 = arith.constant 0 : i32
    %c0_i32_0 = arith.constant 0 : i32
    %c0_i32_1 = arith.constant 0 : i32
    return %c0_i32, %c0_i32_0 : i32, i32
  }
  func.func @transform_4(%arg0: i32) -> (i32, i32) {
    %c0_i32 = arith.constant 0 : i32
    %c0_i32_0 = arith.constant 0 : i32
    %c0_i32_1 = arith.constant 0 : i32
    return %c0_i32, %c0_i32_0 : i32, i32
  }
  func.func @transform_5(%arg0: i32) -> (i32, i32) {
    %c0_i32 = arith.constant 0 : i32
    %c0_i32_0 = arith.constant 0 : i32
    %c0_i32_1 = arith.constant 0 : i32
    return %c0_i32, %c0_i32_0 : i32, i32
  }
  func.func @transform_6(%arg0: i32) -> (i32, i32) {
    %c0_i32 = arith.constant 0 : i32
    %c0_i32_0 = arith.constant 0 : i32
    %c0_i32_1 = arith.constant 0 : i32
    return %c0_i32, %c0_i32_0 : i32, i32
  }
  func.func @transform_7(%arg0: i32) -> (i32, i32) {
    %c0_i32 = arith.constant 0 : i32
    %c0_i32_0 = arith.constant 0 : i32
    %c0_i32_1 = arith.constant 0 : i32
    return %c0_i32, %c0_i32_0 : i32, i32
  }
  func.func @transform_8(%arg0: i32) -> (i32, i32) {
    %c0_i32 = arith.constant 0 : i32
    %c0_i32_0 = arith.constant 0 : i32
    return %arg0, %c0_i32 : i32, i32
  }
}

module attributes {stable_mosaic.version = 11 : i64} {
  func.func @fc_kernel(%arg0: i32, %arg1: memref<3xf32, #tpu.memory_space<smem>>, %arg2: memref<32x128xf32, #tpu.memory_space<vmem>>, %arg3: memref<128x128xf32, #tpu.memory_space<vmem>>, %arg4: memref<1x128xf32, #tpu.memory_space<vmem>>, %arg5: memref<128x128xf32, #tpu.memory_space<vmem>>, %arg6: memref<1x128xf32, #tpu.memory_space<vmem>>, %arg7: memref<128x128xf32, #tpu.memory_space<vmem>>, %arg8: memref<1x128xf32, #tpu.memory_space<vmem>>, %arg9: memref<32x128xf32, #tpu.memory_space<vmem>>) attributes {dimension_semantics = [#tpu.dimension_semantics<parallel>], iteration_bounds = array<i64: 2>, scalar_prefetch = 0 : i64, scratch_operands = 0 : i64, tpu.core_type = #tpu.core_type<tc>, window_params = [{transform_indices = @transform_0, window_bounds = array<i64: 3>}, {transform_indices = @transform_1, window_bounds = array<i64: 32, 128>}, {pipeline_mode = #tpu.pipeline_mode<synchronous>, transform_indices = @transform_2, window_bounds = array<i64: 128, 128>}, {pipeline_mode = #tpu.pipeline_mode<synchronous>, transform_indices = @transform_3, window_bounds = array<i64: 1, 128>}, {pipeline_mode = #tpu.pipeline_mode<synchronous>, transform_indices = @transform_4, window_bounds = array<i64: 128, 128>}, {pipeline_mode = #tpu.pipeline_mode<synchronous>, transform_indices = @transform_5, window_bounds = array<i64: 1, 128>}, {pipeline_mode = #tpu.pipeline_mode<synchronous>, transform_indices = @transform_6, window_bounds = array<i64: 128, 128>}, {pipeline_mode = #tpu.pipeline_mode<synchronous>, transform_indices = @transform_7, window_bounds = array<i64: 1, 128>}, {transform_indices = @transform_8, window_bounds = array<i64: 32, 128>}]} {
    %c0 = arith.constant 0 : index
    %0 = memref.load %arg1[%c0] : memref<3xf32, #tpu.memory_space<smem>>
    %c1 = arith.constant 1 : index
    %1 = memref.load %arg1[%c1] : memref<3xf32, #tpu.memory_space<smem>>
    %c2 = arith.constant 2 : index
    %2 = memref.load %arg1[%c2] : memref<3xf32, #tpu.memory_space<smem>>
    %c0_0 = arith.constant 0 : index
    %c0_1 = arith.constant 0 : index
    %3 = vector.load %arg2[%c0_0, %c0_1] : memref<32x128xf32, #tpu.memory_space<vmem>>, vector<32x128xf32>
    %c0_2 = arith.constant 0 : index
    %c0_3 = arith.constant 0 : index
    %4 = vector.load %arg3[%c0_2, %c0_3] : memref<128x128xf32, #tpu.memory_space<vmem>>, vector<128x128xf32>
    %cst = arith.constant dense<0.000000e+00> : vector<32x128xf32>
    %5 = tpu.matmul %3, %4, %cst {dimension_numbers = #tpu.dot_dimension_numbers<[1], [0], [0], [1], [0, 0, 1, 1], [], []>} : vector<32x128xf32>, vector<128x128xf32>, vector<32x128xf32> -> vector<32x128xf32>
    %c0_4 = arith.constant 0 : index
    %c0_5 = arith.constant 0 : index
    %6 = vector.load %arg4[%c0_4, %c0_5] : memref<1x128xf32, #tpu.memory_space<vmem>>, vector<1x128xf32>
    %7 = vector.broadcast %6 : vector<1x128xf32> to vector<32x128xf32>
    %8 = arith.addf %5, %7 : vector<32x128xf32>
    %cst_6 = arith.constant 0.000000e+00 : f32
    %9 = vector.broadcast %cst_6 : f32 to vector<32x128xf32>
    %10 = arith.cmpf ogt, %8, %9 : vector<32x128xf32>
    %11 = vector.broadcast %0 : f32 to vector<32x128xf32>
    %12 = arith.mulf %11, %8 : vector<32x128xf32>
    %13 = arith.select %10, %8, %12 : vector<32x128xi1>, vector<32x128xf32>
    %c0_7 = arith.constant 0 : index
    %c0_8 = arith.constant 0 : index
    %14 = vector.load %arg5[%c0_7, %c0_8] : memref<128x128xf32, #tpu.memory_space<vmem>>, vector<128x128xf32>
    %cst_9 = arith.constant dense<0.000000e+00> : vector<32x128xf32>
    %15 = tpu.matmul %13, %14, %cst_9 {dimension_numbers = #tpu.dot_dimension_numbers<[1], [0], [0], [1], [0, 0, 1, 1], [], []>} : vector<32x128xf32>, vector<128x128xf32>, vector<32x128xf32> -> vector<32x128xf32>
    %c0_10 = arith.constant 0 : index
    %c0_11 = arith.constant 0 : index
    %16 = vector.load %arg6[%c0_10, %c0_11] : memref<1x128xf32, #tpu.memory_space<vmem>>, vector<1x128xf32>
    %17 = vector.broadcast %16 : vector<1x128xf32> to vector<32x128xf32>
    %18 = arith.addf %15, %17 : vector<32x128xf32>
    %cst_12 = arith.constant 0.000000e+00 : f32
    %19 = vector.broadcast %cst_12 : f32 to vector<32x128xf32>
    %20 = arith.cmpf ogt, %18, %19 : vector<32x128xf32>
    %21 = vector.broadcast %1 : f32 to vector<32x128xf32>
    %22 = arith.mulf %21, %18 : vector<32x128xf32>
    %23 = arith.select %20, %18, %22 : vector<32x128xi1>, vector<32x128xf32>
    %c0_13 = arith.constant 0 : index
    %c0_14 = arith.constant 0 : index
    %24 = vector.load %arg7[%c0_13, %c0_14] : memref<128x128xf32, #tpu.memory_space<vmem>>, vector<128x128xf32>
    %cst_15 = arith.constant dense<0.000000e+00> : vector<32x128xf32>
    %25 = tpu.matmul %23, %24, %cst_15 {dimension_numbers = #tpu.dot_dimension_numbers<[1], [0], [0], [1], [0, 0, 1, 1], [], []>} : vector<32x128xf32>, vector<128x128xf32>, vector<32x128xf32> -> vector<32x128xf32>
    %c0_16 = arith.constant 0 : index
    %c0_17 = arith.constant 0 : index
    %26 = vector.load %arg8[%c0_16, %c0_17] : memref<1x128xf32, #tpu.memory_space<vmem>>, vector<1x128xf32>
    %27 = vector.broadcast %26 : vector<1x128xf32> to vector<32x128xf32>
    %28 = arith.addf %25, %27 : vector<32x128xf32>
    %29 = vector.broadcast %2 : f32 to vector<32x128xf32>
    %30 = arith.mulf %29, %3 : vector<32x128xf32>
    %31 = arith.addf %28, %30 : vector<32x128xf32>
    %c0_18 = arith.constant 0 : index
    %c0_19 = arith.constant 0 : index
    %32 = vector.load %arg9[%c0_18, %c0_19] : memref<32x128xf32, #tpu.memory_space<vmem>>, vector<32x128xf32>
    tpu.vector_store %arg9[%c0_18, %c0_19], %31 {strides = array<i32>} : memref<32x128xf32, #tpu.memory_space<vmem>>, vector<32x128xf32>,
    return
  }
  func.func @transform_0(%arg0: i32) -> i32 {
    %c0_i32 = arith.constant 0 : i32
    %c0_i32_0 = arith.constant 0 : i32
    return %c0_i32 : i32
  }
  func.func @transform_1(%arg0: i32) -> (i32, i32) {
    %c0_i32 = arith.constant 0 : i32
    %c0_i32_0 = arith.constant 0 : i32
    return %arg0, %c0_i32 : i32, i32
  }
  func.func @transform_2(%arg0: i32) -> (i32, i32) {
    %c0_i32 = arith.constant 0 : i32
    %c0_i32_0 = arith.constant 0 : i32
    %c0_i32_1 = arith.constant 0 : i32
    return %c0_i32, %c0_i32_0 : i32, i32
  }
  func.func @transform_3(%arg0: i32) -> (i32, i32) {
    %c0_i32 = arith.constant 0 : i32
    %c0_i32_0 = arith.constant 0 : i32
    %c0_i32_1 = arith.constant 0 : i32
    return %c0_i32, %c0_i32_0 : i32, i32
  }
  func.func @transform_4(%arg0: i32) -> (i32, i32) {
    %c0_i32 = arith.constant 0 : i32
    %c0_i32_0 = arith.constant 0 : i32
    %c0_i32_1 = arith.constant 0 : i32
    return %c0_i32, %c0_i32_0 : i32, i32
  }
  func.func @transform_5(%arg0: i32) -> (i32, i32) {
    %c0_i32 = arith.constant 0 : i32
    %c0_i32_0 = arith.constant 0 : i32
    %c0_i32_1 = arith.constant 0 : i32
    return %c0_i32, %c0_i32_0 : i32, i32
  }
  func.func @transform_6(%arg0: i32) -> (i32, i32) {
    %c0_i32 = arith.constant 0 : i32
    %c0_i32_0 = arith.constant 0 : i32
    %c0_i32_1 = arith.constant 0 : i32
    return %c0_i32, %c0_i32_0 : i32, i32
  }
  func.func @transform_7(%arg0: i32) -> (i32, i32) {
    %c0_i32 = arith.constant 0 : i32
    %c0_i32_0 = arith.constant 0 : i32
    %c0_i32_1 = arith.constant 0 : i32
    return %c0_i32, %c0_i32_0 : i32, i32
  }
  func.func @transform_8(%arg0: i32) -> (i32, i32) {
    %c0_i32 = arith.constant 0 : i32
    %c0_i32_0 = arith.constant 0 : i32
    return %arg0, %c0_i32 : i32, i32
  }
}

</mosaic_0001>

<bundles_post_ra>
// kernel: tpu_custom_call.1
= control target key start
LH: loop header
LB: loop body
LE: loop exit
PB: predicated region body
PF: predicated region fallthrough
CT: control target
= control target key end

     0   :  { %13 = vsyncpa [#allocation5], 0  ;;  %s1871_s0 = inlined_call_operand.hbm [shape: f32[3], index: 0, kind: input, shape index: {}]   ;;  %s1872_s1 = inlined_call_operand.hbm [shape: f32[64,128], index: 1, kind: input, shape index: {}]   ;;  %s1873_s2 = inlined_call_operand.hbm [shape: f32[128,128], index: 2, kind: input, shape index: {}]   ;;  %s1874_s3 = inlined_call_operand.vmem [shape: f32[1,128], index: 3, kind: input, shape index: {}]   ;;  %s1875_s4 = inlined_call_operand.hbm [shape: f32[128,128], index: 4, kind: input, shape index: {}]   ;;  %s1876_s5 = inlined_call_operand.vmem [shape: f32[1,128], index: 5, kind: input, shape index: {}]   ;;  %s1877_s6 = inlined_call_operand.hbm [shape: f32[128,128], index: 6, kind: input, shape index: {}]   ;;  %s1878_s7 = inlined_call_operand.vmem [shape: f32[1,128], index: 7, kind: input, shape index: {}]   ;;  %s1879_s8 = inlined_call_operand.hbm [shape: f32[64,128], index: 8, kind: output, shape index: {}]  }
   0x1   :  { %14 = vsyncpa [#allocation3], 0 }
   0x2   :  { %16 = vsyncpa [#allocation3 + $0x1], 0 }
   0x3   :  { %17 = vsyncpa [#allocation8], 0 }
   0x4   :  { %18 = vsyncpa [#allocation11], 0 }
   0x5   :  { %19 = vsyncpa [#allocation4], 0 }
   0x6   :  { %21 = vsyncpa [#allocation4 + $0x1], 0  ;;  %s1548_s27 = smov 0   ;;  %s1550_s28 = smov 0  }
   0x7   :  { %s1552_s29 = smov 0   ;;  %s1554_s30 = smov 0  }
   0x8 LB: > { %1885 = sst [smem:[#allocation18_spill]] %s1479_s27  ;;  %s1569_s9 = sadd.s32 4294967295, %s1491_s30   ;;  %s1491_s30 = sphi %s1554_s30, %s1910_s30   ;;  %s1487_s29 = sphi %s1552_s29, %s1909_s29   ;;  %s1483_s28 = sphi %s1550_s28, %s1908_s28   ;;  %s1479_s27 = sphi %s1548_s27, %s1907_s27  }
   0x9   : > { %s880_s10 = sadd.s32 4294967294, %s1491_s30   ;;  %p68_p0 = scmp.ne.s32.totalorder %s1483_s28, %s1479_s27 }
   0xa   : > { %p1880_p1 = scmp.eq.s32.totalorder %s1569_s9, 0  ;;  %p224_p3 = scmp.eq.s32.totalorder %s880_s10, 1 }
   0xb   : > { %p881_p5 = scmp.ge.s32.totalorder %s1491_s30, 1  ;;  %p231_p7 = scmp.lt.s32.totalorder %s1491_s30, 3 }
   0xc   : > { %p1578_p4 = por %p1880_p1, %p68_p0  ;;  %p1583_p6 = por %p224_p3, %p68_p0 }
   0xd   : > { %p1588_p8 = pnand %p881_p5, %p231_p7  ;;  %s1493_s14 = smov [#allocation7]  }
   0xe   : > { %s1886_s11 = scalar_select %p1578_p4, 1, 0 }
   0xf   : > { %s1887_s12 = scalar_select %p1583_p6, 1, 0 }
  0x10   : > { %s1889_s13 = scalar_select %p1588_p8, 1, 0 }
  0x11   : > { %1888 = sst [smem:[#allocation19_spill]] %s1887_s12  ;;  %s252_s15 = sshll.u32 %s1493_s14, 4  ;;  %s1592_s15 = int_to_ptr.vmem [resolvable:$true] %s252_s15 }
  0x12   : > { %p1215_p9 = pneg %p1588_p8  ;;  %s1494_s17 = smov [#allocation9]  }
  0x13   : > { %s268_s18 = sshll.u32 %s1494_s17, 4  ;;  %s1286_s21 = scalar_lea.hbm %s1873_s2, 2048  ;;  %s1603_s18 = int_to_ptr.vmem [resolvable:$true] %s268_s18 }
  0x14   : > { %p1599_p11 = pnand %p1215_p9, %p1880_p1  ;;  %p1287_p12 = scmp.ne.s32.totalorder %s1873_s2, %s1286_s21 }
  0x15   : > { %p1293_p5 = scmp.lt.u32.totalorder %s1286_s21, %s1873_s2 }
  0x16   : > { %p1613_p13 = pneg %p1599_p11 }
  0x18   : > { %p1289_p0 = pnand %p1613_p13, %p1287_p12 }
  0x1a   : > { %p1290_p3 = pneg %p1289_p0 }
  0x1c   : > { %p1295_p7 = pnand %p1293_p5, %p1290_p3 }
  0x1e   : > { %1298 = shalt.err (!%p1295_p7)
}
  0x1f   : > { %s1299_s10 = scalar_lea.vmem %s1592_s15, 2048  ;;  %p1307_p2 = scmp.lt.s32.totalorder %s1592_s15, %s1592_s15 }
  0x20   : > { %p1300_p9 = scmp.ne.s32.totalorder %s1592_s15, %s1299_s10  ;;  %p1308_p6 = scmp.lt.s32.totalorder %s1299_s10, %s1299_s10 }
  0x22   : > { %p1302_p10 = pnand %p1300_p9, %p1613_p13  ;;  %p1309_p12 = por %p1308_p6, %p1307_p2 }
  0x24   : > { %p1303_p1 = pneg %p1302_p10 }
  0x26   : > { %p1310_p0 = pnand %p1309_p12, %p1303_p1 }
  0x28   : > { %1313 = shalt.err (!%p1310_p0)
}
  0x29   : > { %s1495_s14 = smov 128   ;;  %s1496_s17 = smov 8  }
  0x2a   : > { %1221 = dma.hbm_to_vmem [thread:$0]  (!%p1599_p11), %s1873_s2, 2048, %s1592_s15, [#allocation8], %s1495_s14, %s1495_s14, %s1496_s17  }
  0x2b   : > { %s1314_s23 = scalar_lea.hbm %s1871_s0, 16 }
  0x2c   : > { %p1315_p1 = scmp.ne.s32.totalorder %s1871_s0, %s1314_s23  ;;  %p1321_p10 = scmp.lt.u32.totalorder %s1314_s23, %s1871_s0 }
  0x2e   : > { %p1317_p2 = pnand %p1315_p1, %p1613_p13 }
  0x30   : > { %p1318_p6 = pneg %p1317_p2 }
  0x32   : > { %p1323_p3 = pnand %p1321_p10, %p1318_p6 }
  0x34   : > { %1326 = shalt.err (!%p1323_p3)
}
  0x35   : > { %s1497_s27 = smov [#allocation2]   ;;  %s1327_s22 = scalar_lea.hbm %s1875_s4, 2048 }
  0x36   : > { %1218 = dma.hbm_to_smem (!%p1599_p11), %s1871_s0, 16, %s1497_s27, [#allocation5]  }
  0x37   : > { %p1328_p5 = scmp.ne.s32.totalorder %s1875_s4, %s1327_s22  ;;  %p1334_p12 = scmp.lt.u32.totalorder %s1327_s22, %s1875_s4 }
  0x39   : > { %p1330_p7 = pnand %p1328_p5, %p1613_p13 }
  0x3b   : > { %p1331_p9 = pneg %p1330_p7 }
  0x3d   : > { %p1336_p0 = pnand %p1334_p12, %p1331_p9 }
  0x3f   : > { %1339 = shalt.err (!%p1336_p0)
}
  0x40   : > { %s1340_s27 = scalar_lea.vmem %s1603_s18, 2048  ;;  %p1348_p10 = scmp.lt.s32.totalorder %s1603_s18, %s1603_s18 }
  0x41   : > { %p1341_p1 = scmp.ne.s32.totalorder %s1603_s18, %s1340_s27  ;;  %p1349_p3 = scmp.lt.s32.totalorder %s1340_s27, %s1340_s27 }
  0x43   : > { %p1343_p2 = pnand %p1341_p1, %p1613_p13  ;;  %p1350_p5 = por %p1349_p3, %p1348_p10 }
  0x45   : > { %p1344_p6 = pneg %p1343_p2 }
  0x47   : > { %p1351_p7 = pnand %p1350_p5, %p1344_p6 }
  0x49   : > { %1354 = shalt.err (!%p1351_p7)
}
  0x4a   : > { %1224 = dma.hbm_to_vmem [thread:$0]  (!%p1599_p11), %s1875_s4, 2048, %s1603_s18, [#allocation8], %s1495_s14, %s1495_s14, %s1496_s17  }
  0x4b   : > { %s1498_s19 = smov [#allocation10]   ;;  %s1355_s25 = scalar_lea.hbm %s1877_s6, 2048 }
  0x4c   : > { %s284_s20 = sshll.u32 %s1498_s19, 4  ;;  %p1356_p9 = scmp.ne.s32.totalorder %s1877_s6, %s1355_s25  ;;  %s285_s20 = int_to_ptr.vmem [resolvable:$true] %s284_s20 }
  0x4d   : > { %p1362_p1 = scmp.lt.u32.totalorder %s1355_s25, %s1877_s6 }
  0x4e   : > { %p1358_p12 = pnand %p1356_p9, %p1613_p13 }
  0x50   : > { %p1359_p0 = pneg %p1358_p12 }
  0x52   : > { %p1364_p2 = pnand %p1362_p1, %p1359_p0 }
  0x54   : > { %1367 = shalt.err (!%p1364_p2)
}
  0x55   : > { %s1368_s18 = scalar_lea.vmem %s285_s20, 2048  ;;  %p1376_p5 = scmp.lt.s32.totalorder %s285_s20, %s285_s20 }
  0x56   : > { %p1369_p6 = scmp.ne.s32.totalorder %s285_s20, %s1368_s18  ;;  %p1377_p7 = scmp.lt.s32.totalorder %s1368_s18, %s1368_s18 }
  0x58   : > { %p1371_p10 = pnand %p1369_p6, %p1613_p13  ;;  %p1378_p4 = por %p1377_p7, %p1376_p5 }
  0x5a   : > { %p1372_p3 = pneg %p1371_p10 }
  0x5c   : > { %p1379_p8 = pnand %p1378_p4, %p1372_p3 }
  0x5e   : > { %1382 = shalt.err (!%p1379_p8)
}
  0x5f   : > { %1227 = dma.hbm_to_vmem [thread:$0]  (!%p1599_p11), %s1877_s6, 2048, %s285_s20, [#allocation11], %s1495_s14, %s1495_s14, %s1496_s17  }
  0x60   : > { %s1701_s24 = sadd.s32 1, %s1491_s30   ;;  %s55_s16 = sadd.s32 1, %s1487_s29 }
  0x61   : > { %s52_s19 = ssub.s32 %s1491_s30, %s1701_s24  ;;  %p62_p4 = scmp.ne.s32.totalorder %s1487_s29, %s1483_s28 }
  0x62   : > { %p53_p8 = scmp.eq.s32.totalorder %s52_s19, 0  ;;  %p63_p13 = scmp.eq.s32.totalorder %s1491_s30, 0 }
  0x63   : > { %p1892_p9 = scmp.eq.s32.totalorder %s1569_s9, 1  ;;  %p1240_p0 = scmp.lt.s32.totalorder %s1491_s30, 2 }
  0x64   : > { %s1717_s22 = scalar_select %p53_p8, %s1487_s29, %s55_s16  }
  0x65   : > { %p1711_p12 = por %p1892_p9, %p62_p4  ;;  %p64_p1 = por %p63_p13, %p62_p4 }
  0x66   : > { %s301_s25 = sand.u32 1, %s1487_s29   ;;  %s907_s20 = sshll.u32 %s1491_s30, 9 }
  0x67   : > { %s887_s26 = sshll.u32 %s301_s25, 5  ;;  %s1724_s27 = scalar_lea.hbm %s1872_s1, %s907_s20 }
  0x68   : > { %s305_s18 = scalar_lea.vmem [#allocation6], %s887_s26  ;;  %p1728_p11 = pnand %p1240_p0, %p64_p1 }
  0x69   : > { %s312_s10 = sshll.u32 %s305_s18, 4  ;;  %s1732_s16 = scalar_lea.sflag [#allocation3], %s301_s25  ;;  %s1726_s10 = int_to_ptr.vmem [resolvable:$true] %s312_s10 }
  0x6a   : > { %s1383_s19 = scalar_lea.hbm %s1724_s27, 512  ;;  %p1385_p6 = pneg %p1728_p11 }
  0x6b   : > { %p1384_p2 = scmp.ne.s32.totalorder %s1724_s27, %s1383_s19  ;;  %s1388_s12 = scalar_lea.hbm %s1872_s1, 1024 }
  0x6c   : > { %p1389_p5 = scmp.lt.u32.totalorder %s1724_s27, %s1872_s1  ;;  %p1390_p7 = scmp.lt.u32.totalorder %s1388_s12, %s1383_s19 }
  0x6d   : > { %p1386_p10 = pnand %p1385_p6, %p1384_p2  ;;  %p1392_p8 = scmp.lt.u32.totalorder %s1383_s19, %s1724_s27 }
  0x6e   : > { %p1391_p4 = por %p1390_p7, %p1389_p5 }
  0x6f   : > { %p1387_p3 = pneg %p1386_p10 }
  0x70   : > { %p1393_p13 = por %p1392_p8, %p1391_p4 }
  0x72   : > { %p1394_p9 = pnand %p1393_p13, %p1387_p3 }
  0x74   : > { %1397 = shalt.err (!%p1394_p9)
}
  0x75   : > { %s1398_s25 = scalar_lea.vmem %s1726_s10, 512  ;;  %s1499_s26 = smov [#allocation6]  }
  0x76   : > { %p1399_p0 = scmp.ne.s32.totalorder %s1726_s10, %s1398_s25  ;;  %s1403_s20 = sshll.u32 %s1499_s26, 4  ;;  %s1404_s20 = int_to_ptr.vmem [resolvable:$false] %s1403_s20 }
  0x77   : > { %s1405_s23 = scalar_lea.vmem %s1404_s20, 1024  ;;  %p1406_p10 = scmp.lt.s32.totalorder %s1726_s10, %s1404_s20 }
  0x78   : > { %p1401_p1 = pnand %p1399_p0, %p1385_p6  ;;  %p1407_p5 = scmp.lt.s32.totalorder %s1405_s23, %s1398_s25 }
  0x7a   : > { %p1402_p2 = pneg %p1401_p1  ;;  %p1408_p7 = por %p1407_p5, %p1406_p10 }
  0x7c   : > { %p1409_p4 = pnand %p1408_p7, %p1402_p2 }
  0x7e   : > { %1412 = shalt.err (!%p1409_p4)
}
  0x7f   : > { %1231 = dma.hbm_to_vmem [thread:$0]  (!%p1728_p11), %s1724_s27, 512, %s1726_s10, %s1732_s16, %s1495_s14, %s1495_s14, %s1496_s17  }
  0x80   : > { %p1895_p6 = scmp.ne.s32.totalorder %s1889_s13, 0 }
  0x81   : > { %p1896_p3 = scmp.eq.s32.totalorder (!%p1895_p6), %s1569_s9, 0 }
  0x82   : > { %324 = sbr.rel (%p1895_p6) target bundleno = 860 (0x35c), region = 52 }
  0x89   : > { %1458 = dma.done.wait (%p1896_p3), [#allocation5], 16   ;;  %p1897_p8 = pmov %p1896_p3 }
  0x8a   : > { %s1770_s19 = sand.u32 1, %s1483_s28   ;;  %p1898_p11 = scmp.ne.s32.totalorder %s1886_s11, 0 }
  0x8b   : > { %1460 = vsyncadd (%p1897_p8), [#allocation5], 4294967280  ;;  %s892_s15 = sshll.u32 %s1770_s19, 5  ;;  %s331_s12 = scalar_lea.sflag [#allocation3], %s1770_s19 }
  0x8c   : > { %s1776_s14 = scalar_lea.vmem [#allocation6], %s892_s15 }
  0x8d   : > { %1462 = dma.done.wait (%p1898_p11), %s331_s12, 512  }
  0x8e   : > { %1464 = vsyncadd (%p1898_p11), %s331_s12, 4294966784  ;;  %p1899_p13 = pmov %p1896_p3 }
  0x8f   : > { %p1900_p9 = pmov %p1896_p3 }
  0x90   : > { %1466 = dma.done.wait (%p1899_p13), [#allocation8], 4096  }
  0x91   : > { %1468 = vsyncadd (%p1900_p9), [#allocation8], 4294963200  ;;  %p1901_p0 = pmov %p1896_p3 }
  0x93   : > { %1470 = dma.done.wait (%p1901_p0), [#allocation11], 2048   ;;  %p1902_p1 = pmov %p1901_p0 }
  0x95   : > { %1472 = vsyncadd (%p1902_p1), [#allocation11], 4294965248 }
  0x96   : > { %351 = sfence }
  0x97   : > { %v389_v0 = vld [vmem:[#allocation7] sm:$0xff]  ;;  %v390_v1 = vld [vmem:[#allocation7 + $0x8] sm:$0xff]  ;;  %v391_v2 = vld [vmem:[#allocation7 + $0x10] sm:$0xff]  ;;  %s382_s11 = sld [smem:[#allocation2]]  ;;  %s897_s27 = sld [smem:[#allocation2 + $0x1]] }
  0x98   : > { %v1083_v3 = vpack.c.bf16 %v390_v1, %v389_v0  ;;  %v392_v4 = vld [vmem:[#allocation7 + $0x18] sm:$0xff]  ;;  %v393_v6 = vld [vmem:[#allocation7 + $0x20] sm:$0xff]  ;;  %v394_v7 = vld [vmem:[#allocation7 + $0x28] sm:$0xff]  ;;  %s898_s18 = sld [smem:[#allocation2 + $0x2]]  ;;  %s379_s20 = scalar_lea.vmem [#allocation12], %s892_s15 }
  0x99   : > { %v1087_v5 = vpack.c.bf16 %v392_v4, %v391_v2  ;;  %v1091_v8 = vpack.c.bf16 %v394_v7, %v393_v6  ;;  %v1791_v9 = vld [vmem:[%s1776_s14] sm:$0xff]  ;;  %v395_v10 = vld [vmem:[#allocation7 + $0x30] sm:$0xff]  ;;  %v396_v11 = vld [vmem:[#allocation7 + $0x38] sm:$0xff]  ;;  %s766_s23 = sshll.u32 %s379_s20, 4  ;;  %s908_s12 = sshll.u32 %s1569_s9, 9  ;;  %s1822_s23 = int_to_ptr.vmem [resolvable:$true] %s766_s23 }
  0x9a   : > { %1084 = vmatprep.subr.bf16.mxu0 %v1083_v3  ;;  %1001 = vmatprep.mubr.f32.mxu0 %v1791_v9  ;;  %v510_v12 = vld [vmem:[#allocation9] sm:$0xff]  ;;  %v511_v13 = vld [vmem:[#allocation9 + $0x8] sm:$0xff]  ;;  %v512_v14 = vld [vmem:[#allocation9 + $0x10] sm:$0xff]  ;;  %v1095_v18 = vpack.c.bf16 %v396_v11, %v395_v10  ;;  %s753_s9 = scalar_lea.sflag [#allocation4], %s1770_s19  ;;  %s1413_s13 = scalar_lea.vmem %s1822_s23, 512 }
  0x9b   : > { %1086 = vmatpush3.bf16.msra.mxu0 %v1083_v3  ;;  %v513_v15 = vld [vmem:[#allocation9 + $0x18] sm:$0xff]  ;;  %v1115_v16 = vpack.c.bf16 %v511_v13, %v510_v12  ;;  %v514_v19 = vld [vmem:[#allocation9 + $0x20] sm:$0xff]  ;;  %v515_v20 = vld [vmem:[#allocation9 + $0x28] sm:$0xff]  ;;  %p1414_p2 = scmp.ne.s32.totalorder %s1822_s23, %s1413_s13  ;;  %s1500_s17 = smov [#allocation12]  }
  0x9c   : > { %1088 = vmatprep.subr.bf16.mxu0 %v1087_v5  ;;  %v1119_v17 = vpack.c.bf16 %v513_v15, %v512_v14  ;;  %v397_v21 = vld [vmem:[#allocation7 + $0x40] sm:$0xff]  ;;  %v398_v22 = vld [vmem:[#allocation7 + $0x48] sm:$0xff]  ;;  %v1123_v23 = vpack.c.bf16 %v515_v20, %v514_v19  ;;  %v516_v25 = vld [vmem:[#allocation9 + $0x30] sm:$0xff] }
  0x9d   : > { %1116 = vmatprep.subr.bf16.mxu1 %v1115_v16  ;;  %v1099_v24 = vpack.c.bf16 %v398_v22, %v397_v21  ;;  %v517_v26 = vld [vmem:[#allocation9 + $0x38] sm:$0xff]  ;;  %v399_v27 = vld [vmem:[#allocation7 + $0x50] sm:$0xff]  ;;  %v518_v31 = vld [vmem:[#allocation9 + $0x40] sm:$0xff]  ;;  %p1415_p10 = pnand %p1414_p2, %p1711_p12 }
  0x9e   : > { %1118 = vmatpush3.bf16.msra.mxu1 %v1115_v16  ;;  %v400_v28 = vld [vmem:[#allocation7 + $0x58] sm:$0xff]  ;;  %v1127_v29 = vpack.c.bf16 %v517_v26, %v516_v25  ;;  %v519_v32 = vld [vmem:[#allocation9 + $0x48] sm:$0xff]  ;;  %v401_v33 = vld [vmem:[#allocation7 + $0x60] sm:$0xff] }
  0x9f   : > { %1090 = vmatpush3.bf16.msra.mxu0 %v1087_v5  ;;  %1120 = vmatprep.subr.bf16.mxu1 %v1119_v17  ;;  %v1103_v30 = vpack.c.bf16 %v400_v28, %v399_v27  ;;  %v402_v34 = vld [vmem:[#allocation7 + $0x68] sm:$0xff]  ;;  %v1131_v35 = vpack.c.bf16 %v519_v32, %v518_v31  ;;  %v520_v37 = vld [vmem:[#allocation9 + $0x50] sm:$0xff]  ;;  %v521_v38 = vld [vmem:[#allocation9 + $0x58] sm:$0xff]  ;;  %p1416_p5 = pneg %p1415_p10 }
  0xa0   : > { %1092 = vmatprep.subr.bf16.mxu0 %v1091_v8  ;;  %v1107_v36 = vpack.c.bf16 %v402_v34, %v401_v33  ;;  %v403_v39 = vld [vmem:[#allocation7 + $0x70] sm:$0xff]  ;;  %v404_v40 = vld [vmem:[#allocation7 + $0x78] sm:$0xff]  ;;  %v1135_v41 = vpack.c.bf16 %v521_v38, %v520_v37  ;;  %v1795_v43 = vld [vmem:[%s1776_s14 + $0x8] sm:$0xff]  ;;  %v622_v33 = vstv %s897_s27  ;;  %s1417_s27 = sshll.u32 %s1500_s17, 4  ;;  %s1418_s27 = int_to_ptr.vmem [resolvable:$false] %s1417_s27 }
  0xa1   : > { %v1111_v42 = vpack.c.bf16 %v404_v40, %v403_v39  ;;  %v1798_v44 = vld [vmem:[%s1776_s14 + $0x10] sm:$0xff]  ;;  %v1803_v45 = vld [vmem:[%s1776_s14 + $0x18] sm:$0xff]  ;;  %v522_v46 = vld [vmem:[#allocation9 + $0x60] sm:$0xff]  ;;  %s1419_s10 = scalar_lea.vmem %s1418_s27, 1024  ;;  %p1420_p7 = scmp.lt.s32.totalorder %s1822_s23, %s1418_s27 }
  0xa2   : > { %1122 = vmatpush3.bf16.msra.mxu1 %v1119_v17  ;;  %v523_v47 = vld [vmem:[#allocation9 + $0x68] sm:$0xff]  ;;  %v524_v49 = vld [vmem:[#allocation9 + $0x70] sm:$0xff]  ;;  %v525_v50 = vld [vmem:[#allocation9 + $0x78] sm:$0xff]  ;;  %p1421_p4 = scmp.lt.s32.totalorder %s1419_s10, %s1413_s13 }
  0xa3   : > { %1094 = vmatpush3.bf16.msra.mxu0 %v1091_v8  ;;  %1124 = vmatprep.subr.bf16.mxu1 %v1123_v23  ;;  %v1139_v48 = vpack.c.bf16 %v523_v47, %v522_v46  ;;  %v1143_v51 = vpack.c.bf16 %v525_v50, %v524_v49  ;;  %v631_v52 = vld [vmem:[#allocation10] sm:$0xff]  ;;  %v632_v53 = vld [vmem:[#allocation10 + $0x8] sm:$0xff]  ;;  %v633_v54 = vld [vmem:[#allocation10 + $0x10] sm:$0xff]  ;;  %v501_v8 = vstv %s382_s11  ;;  %s1827_s11 = scalar_lea.hbm %s1879_s8, %s908_s12 }
  0xa4   : > { %1096 = vmatprep.subr.bf16.mxu0 %v1095_v18  ;;  %v1147_v55 = vpack.c.bf16 %v632_v53, %v631_v52  ;;  %v634_v56 = vld [vmem:[#allocation10 + $0x18] sm:$0xff]  ;;  %v635_v58 = vld [vmem:[#allocation10 + $0x20] sm:$0xff]  ;;  %v636_v59 = vld [vmem:[#allocation10 + $0x28] sm:$0xff]  ;;  %v739_v52 = vstv %s898_s18  ;;  %p1422_p6 = por %p1421_p4, %p1420_p7 }
  0xa5   : > { %v1151_v57 = vpack.c.bf16 %v634_v56, %v633_v54  ;;  %v1155_v60 = vpack.c.bf16 %v636_v59, %v635_v58  ;;  %v637_v61 = vld [vmem:[#allocation10 + $0x30] sm:$0xff]  ;;  %v638_v62 = vld [vmem:[#allocation10 + $0x38] sm:$0xff]  ;;  %v639_v0 = vld [vmem:[#allocation10 + $0x40] sm:$0xff]  ;;  %v741_v54 = vmul.f32 %v739_v52, %v1795_v43 }
  0xa6   : > { %1126 = vmatpush3.bf16.msra.mxu1 %v1123_v23  ;;  %v1159_v63 = vpack.c.bf16 %v638_v62, %v637_v61  ;;  %v640_v1 = vld [vmem:[#allocation10 + $0x48] sm:$0xff]  ;;  %v641_v3 = vld [vmem:[#allocation10 + $0x50] sm:$0xff]  ;;  %v642_v4 = vld [vmem:[#allocation10 + $0x58] sm:$0xff]  ;;  %v742_v62 = vmul.f32 %v739_v52, %v1798_v44  ;;  %p1423_p3 = pnand %p1422_p6, %p1416_p5 }
  0xa7   : > { %1098 = vmatpush3.bf16.msra.mxu0 %v1095_v18  ;;  %1128 = vmatprep.subr.bf16.mxu1 %v1127_v29  ;;  %v1163_v2 = vpack.c.bf16 %v640_v1, %v639_v0  ;;  %v1167_v5 = vpack.c.bf16 %v642_v4, %v641_v3  ;;  %v899_v6 = vld [vmem:[%s1874_s3] ss:$0 sm:$0xff]  ;;  %v644_v26 = vld [vmem:[#allocation10 + $0x68] sm:$0xff]  ;;  %v645_v28 = vld [vmem:[#allocation10 + $0x70] sm:$0xff] }
  0xa8   : > { %1100 = vmatprep.subr.bf16.mxu0 %v1099_v24  ;;  %v643_v25 = vld [vmem:[#allocation10 + $0x60] sm:$0xff] }
  0xa9   : > { %v1171_v27 = vpack.c.bf16 %v644_v26, %v643_v25  ;;  %v900_v31 = vld [vmem:[%s1876_s5] ss:$0 sm:$0xff] }
  0xaa   : > { %1130 = vmatpush3.bf16.msra.mxu1 %v1127_v29  ;;  %v646_v29 = vld [vmem:[#allocation10 + $0x78] sm:$0xff]  ;;  %v901_v53 = vld [vmem:[%s1878_s7] ss:$0 sm:$0xff] }
  0xab   : > { %1102 = vmatpush3.bf16.msra.mxu0 %v1099_v24  ;;  %1132 = vmatprep.subr.bf16.mxu1 %v1131_v35 }
  0xac   : > { %1104 = vmatprep.subr.bf16.mxu0 %v1103_v30 }
  0xae   : > { %1134 = vmatpush3.bf16.msra.mxu1 %v1131_v35 }
  0xaf   : > { %1106 = vmatpush3.bf16.msra.mxu0 %v1103_v30  ;;  %1136 = vmatprep.subr.bf16.mxu1 %v1135_v41  ;;  %v1175_v30 = vpack.c.bf16 %v646_v29, %v645_v28 }
  0xb0   : > { %1108 = vmatprep.subr.bf16.mxu0 %v1107_v36 }
  0xb2   : > { %1138 = vmatpush3.bf16.msra.mxu1 %v1135_v41 }
  0xb3   : > { %1110 = vmatpush3.bf16.msra.mxu0 %v1107_v36  ;;  %1140 = vmatprep.subr.bf16.mxu1 %v1139_v48 }
  0xb4   : > { %1112 = vmatprep.subr.bf16.mxu0 %v1111_v42 }
  0xb6   : > { %1142 = vmatpush3.bf16.msra.mxu1 %v1139_v48 }
  0xb7   : > { %1114 = vmatpush3.bf16.msra.mxu0 %v1111_v42  ;;  %1144 = vmatprep.subr.bf16.mxu1 %v1143_v51 }
  0xb8   : > { %1148 = vmatprep.subr.bf16.mxu0 %v1147_v55 }
  0xba   : > { %1002 = vmatmul.mubr.f32.vlgmr.msra.gmra.mrb[0].mxu0 %v1795_v43  ;;  %1146 = vmatpush3.bf16.msra.mxu1 %v1143_v51 }
  0xbb   : > { %1004 = vmatprep.mubr.f32.mxu0 %v1798_v44  ;;  %1179 = vmatprep.subr.bf16.mxu1 %v1147_v55 }
  0xbc   : > { %1150 = vmatpush3.bf16.msra.mxu0 %v1147_v55 }
  0xbd   : > { %1152 = vmatprep.subr.bf16.mxu0 %v1151_v57 }
  0xbe   : > { %1005 = vmatmul.mubr.f32.gmra.mrb[2].mxu0 %v1803_v45 }
  0xc0   : > { %1154 = vmatpush3.bf16.msra.mxu0 %v1151_v57 }
  0xc1   : > { %1156 = vmatprep.subr.bf16.mxu0 %v1155_v60 }
  0xc4   : > { %1158 = vmatpush3.bf16.msra.mxu0 %v1155_v60 }
  0xc5   : > { %1160 = vmatprep.subr.bf16.mxu0 %v1159_v63 }
  0xc8   : > { %1162 = vmatpush3.bf16.msra.mxu0 %v1159_v63 }
  0xc9   : > { %1164 = vmatprep.subr.bf16.mxu0 %v1163_v2 }
  0xcc   : > { %1166 = vmatpush3.bf16.msra.mxu0 %v1163_v2 }
  0xcd   : > { %1168 = vmatprep.subr.bf16.mxu0 %v1167_v5 }
  0xd0   : > { %1170 = vmatpush3.bf16.msra.mxu0 %v1167_v5 }
  0xd1   : > { %1172 = vmatprep.subr.bf16.mxu0 %v1171_v27 }
  0xd4   : > { %1174 = vmatpush3.bf16.msra.mxu0 %v1171_v27 }
  0xd5   : > { %1176 = vmatprep.subr.bf16.mxu0 %v1175_v30 }
  0xd8   : > { %1178 = vmatpush3.bf16.msra.mxu0 %v1175_v30 }
 0x18d   : > { %v1003_v7 = vpop.f32.mrb[0].mxu0 }
 0x18e   : > { %v484_v10 = vadd.f32 %v1003_v7, %v899_v6  ;;  %v478_v11 = vpop.f32.mrb[1].mxu0 }
 0x18f   : > { %v479_v12 = vadd.f32 %v899_v6, %v478_v11 }
 0x190   : > { %v503_v13 = vmul.f32 %v501_v8, %v484_v10  ;;  %vm498_vm1 = vcmp.gt.f32.partialorder %v484_v10, 0.0 }
 0x191   : > { %v1006_v14 = vpop.f32.mrb[2].mxu0  ;;  %vm497_vm0 = vcmp.gt.f32.partialorder %v479_v12, 0.0  ;;  %v502_v15 = vmul.f32 %v501_v8, %v479_v12 }
 0x192   : > { %v494_v16 = vadd.f32 %v1006_v14, %v899_v6  ;;  %v488_v17 = vpop.f32.mrb[3].mxu0  ;;  %v507_v21 = vsel %vm498_vm1, %v484_v10, %v503_v13 }
 0x193   : > { %v489_v18 = vadd.f32 %v899_v6, %v488_v17  ;;  %v506_v19 = vsel %vm497_vm0, %v479_v12, %v502_v15 }
 0x194   : > { %v505_v20 = vmul.f32 %v501_v8, %v494_v16  ;;  %1039 = vmatprep.mubr.f32.mxu1 %v506_v19  ;;  %vm500_vm3 = vcmp.gt.f32.partialorder %v494_v16, 0.0 }
 0x195   : > { %v504_v22 = vmul.f32 %v501_v8, %v489_v18  ;;  %1040 = vmatmul.mubr.f32.vlgmr.msra.gmra.mrb[0].mxu1 %v507_v21  ;;  %vm499_vm2 = vcmp.gt.f32.partialorder %v489_v18, 0.0 }
 0x196   : > { %1187 = vmatpush3.bf16.msra.mxu1 %v1147_v55  ;;  %v509_v24 = vsel %vm500_vm3, %v494_v16, %v505_v20  ;;  %v740_v55 = vmul.f32 %v739_v52, %v1791_v9 }
 0x197   : > { %v508_v23 = vsel %vm499_vm2, %v489_v18, %v504_v22  ;;  %1180 = vmatprep.subr.bf16.mxu1 %v1151_v57 }
 0x198   : > { %1042 = vmatprep.mubr.f32.mxu1 %v508_v23 }
 0x199   : > { %1043 = vmatmul.mubr.f32.gmra.mrb[2].mxu1 %v509_v24 }
 0x19a   : > { %1188 = vmatpush3.bf16.msra.mxu1 %v1151_v57 }
 0x19b   : > { %1181 = vmatprep.subr.bf16.mxu1 %v1155_v60 }
 0x19e   : > { %1189 = vmatpush3.bf16.msra.mxu1 %v1155_v60  ;;  %v743_v60 = vmul.f32 %v739_v52, %v1803_v45 }
 0x19f   : > { %1182 = vmatprep.subr.bf16.mxu1 %v1159_v63 }
 0x1a2   : > { %1190 = vmatpush3.bf16.msra.mxu1 %v1159_v63 }
 0x1a3   : > { %1183 = vmatprep.subr.bf16.mxu1 %v1163_v2 }
 0x1a6   : > { %1191 = vmatpush3.bf16.msra.mxu1 %v1163_v2 }
 0x1a7   : > { %1184 = vmatprep.subr.bf16.mxu1 %v1167_v5 }
 0x1aa   : > { %1192 = vmatpush3.bf16.msra.mxu1 %v1167_v5 }
 0x1ab   : > { %1185 = vmatprep.subr.bf16.mxu1 %v1171_v27 }
 0x1ae   : > { %1193 = vmatpush3.bf16.msra.mxu1 %v1171_v27 }
 0x1af   : > { %1186 = vmatprep.subr.bf16.mxu1 %v1175_v30 }
 0x1b2   : > { %1194 = vmatpush3.bf16.msra.mxu1 %v1175_v30 }
 0x268   : > { %v1041_v32 = vpop.f32.mrb[0].mxu1 }
 0x269   : > { %v605_v34 = vadd.f32 %v1041_v32, %v900_v31  ;;  %v599_v35 = vpop.f32.mrb[1].mxu1 }
 0x26a   : > { %v600_v36 = vadd.f32 %v900_v31, %v599_v35 }
 0x26b   : > { %v624_v37 = vmul.f32 %v622_v33, %v605_v34  ;;  %vm619_vm4 = vcmp.gt.f32.partialorder %v605_v34, 0.0 }
 0x26c   : > { %v623_v38 = vmul.f32 %v622_v33, %v600_v36  ;;  %v1044_v39 = vpop.f32.mrb[2].mxu1  ;;  %vm618_vm5 = vcmp.gt.f32.partialorder %v600_v36, 0.0 }
 0x26d   : > { %v615_v40 = vadd.f32 %v1044_v39, %v900_v31  ;;  %v609_v41 = vpop.f32.mrb[3].mxu1  ;;  %v628_v47 = vsel %vm619_vm4, %v605_v34, %v624_v37 }
 0x26e   : > { %v610_v42 = vadd.f32 %v900_v31, %v609_v41  ;;  %v627_v46 = vsel %vm618_vm5, %v600_v36, %v623_v38 }
 0x26f   : > { %v626_v48 = vmul.f32 %v622_v33, %v615_v40  ;;  %1077 = vmatprep.mubr.f32.mxu0 %v627_v46  ;;  %vm621_vm6 = vcmp.gt.f32.partialorder %v615_v40, 0.0 }
 0x270   : > { %v625_v49 = vmul.f32 %v622_v33, %v610_v42  ;;  %1078 = vmatmul.mubr.f32.vlgmr.msra.gmra.mrb[4].mxu0 %v628_v47  ;;  %vm620_vm7 = vcmp.gt.f32.partialorder %v610_v42, 0.0 }
 0x271   : > { %v630_v51 = vsel %vm621_vm6, %v615_v40, %v626_v48 }
 0x272   : > { %v629_v50 = vsel %vm620_vm7, %v610_v42, %v625_v49 }
 0x273   : > { %1080 = vmatprep.mubr.f32.mxu1 %v629_v50 }
 0x274   : > { %1081 = vmatmul.mubr.f32.vlgmr.msra.gmra.mrb[4].mxu1 %v630_v51 }
 0x343   : > { %v1079_v56 = vpop.f32.mrb[4].mxu0 }
 0x344   : > { %v726_v57 = vadd.f32 %v1079_v56, %v901_v53  ;;  %v720_v58 = vpop.f32.mrb[5].mxu0 }
 0x345   : > { %v721_v59 = vadd.f32 %v901_v53, %v720_v58 }
 0x346   : > { %v745_v61 = vadd.f32 %v741_v54, %v726_v57 }
 0x347   : > { %v744_v63 = vadd.f32 %v740_v55, %v721_v59  ;;  %v1082_v0 = vpop.f32.mrb[4].mxu1 }
 0x348   : > { %749 = vst [vmem:[%s379_s20 + $0x8] sm:$0xff] %v745_v61  ;;  %v736_v43 = vadd.f32 %v1082_v0, %v901_v53  ;;  %v730_v9 = vpop.f32.mrb[5].mxu1 }
 0x349   : > { %748 = vst [vmem:[%s379_s20] sm:$0xff] %v744_v63  ;;  %v731_v45 = vadd.f32 %v901_v53, %v730_v9 }
 0x34a   : > { %v747_v1 = vadd.f32 %v743_v60, %v736_v43 }
 0x34b   : > { %v746_v44 = vadd.f32 %v742_v62, %v731_v45 }
 0x34c   : > { %751 = vst [vmem:[%s379_s20 + $0x18] sm:$0xff] %v747_v1 }
 0x34d   : > { %750 = vst [vmem:[%s379_s20 + $0x10] sm:$0xff] %v746_v44 }
 0x34e   : > { %1426 = shalt.err (!%p1423_p3)
}
 0x34f   : > { %s1427_s16 = scalar_lea.hbm %s1827_s11, 512  ;;  %s1431_s26 = scalar_lea.hbm %s1879_s8, 1024 }
 0x350   : > { %p1428_p8 = scmp.ne.s32.totalorder %s1827_s11, %s1427_s16  ;;  %p1432_p9 = scmp.lt.u32.totalorder %s1827_s11, %s1879_s8 }
 0x351   : > { %p1433_p0 = scmp.lt.u32.totalorder %s1431_s26, %s1427_s16  ;;  %p1435_p2 = scmp.lt.u32.totalorder %s1427_s16, %s1827_s11 }
 0x352   : > { %p1429_p11 = pnand %p1428_p8, %p1711_p12 }
 0x353   : > { %p1434_p1 = por %p1433_p0, %p1432_p9 }
 0x354   : > { %p1430_p13 = pneg %p1429_p11 }
 0x355   : > { %p1436_p10 = por %p1435_p2, %p1434_p1 }
 0x357   : > { %p1437_p5 = pnand %p1436_p10, %p1430_p13 }
 0x359   : > { %1440 = shalt.err (!%p1437_p5)
}
 0x35a   : > { %s1501_s15 = smov 128   ;;  %s1502_s14 = smov 8  }
 0x35b   : > { %1213 = dma.vmem_to_hbm [thread:$0]  (%p1711_p12), %s1822_s23, 512, %s1827_s11, %s753_s9, %s1501_s15, %s1501_s15, %s1502_s14  }
 0x35c PF: > { %s1903_s13 = sld [smem:[#allocation18_spill]]  ;;  %s1904_s17 = sld [smem:[#allocation19_spill]] }
 0x35d   : > { %p1906_p4 = scmp.ge.s32.totalorder %s1491_s30, 2 }
 0x362   : > { %s781_s27 = sand.u32 1, %s1903_s13   ;;  %p1905_p7 = scmp.ne.s32.totalorder %s1904_s17, 0 }
 0x363   : > { %s782_s10 = scalar_lea.sflag [#allocation4], %s781_s27 }
 0x364   : > { %p1233_p6 = pnand %p1906_p4, %p1905_p7 }
 0x366   : > { %1474 = dma.done.wait (!%p1233_p6), %s782_s10, 512  }
 0x367   : > { %1476 = vsyncadd (!%p1233_p6), %s782_s10, 4294966784  ;;  %p24_p3 = scmp.ge.s32.totalorder %s1701_s24, 4   ;;  %s1907_s27 = smov %s1483_s28 }
 0x368   : > { %s1908_s28 = smov %s1487_s29  ;;  %s1909_s29 = smov %s1717_s22 }
 0x369   : > { %s1910_s30 = smov %s1701_s24  ;;  %26 = sbr.rel (!%p24_p3) target bundleno = 8 (0x8), region = 114 }
 0x370   :  { %787 = vsyncpa [#allocation3], 1 }
 0x371   :  { %789 = vsyncpa [#allocation3 + $0x1], 1 }
 0x372   :  { %790 = vsyncpa [#allocation8], 1 }
 0x373   :  { %791 = vsyncpa [#allocation11], 1 }
 0x374   :  { %792 = vsyncpa [#allocation4], 1 }
 0x375   :  { %794 = vsyncpa [#allocation4 + $0x1], 1 }
 0x376   :  { %795 = vsyncpa [#allocation5], 1 }
 0x377   :  { %797 = vsyncpa [#allocation5 + $0x1], 1 }

// kernel: tpu_custom_call.1
= control target key start
LH: loop header
LB: loop body
LE: loop exit
PB: predicated region body
PF: predicated region fallthrough
CT: control target
= control target key end

     0   :  { %13 = vsyncpa [#allocation5], 0  ;;  %s1871_s0 = inlined_call_operand.hbm [shape: f32[3], index: 0, kind: input, shape index: {}]   ;;  %s1872_s1 = inlined_call_operand.hbm [shape: f32[64,128], index: 1, kind: input, shape index: {}]   ;;  %s1873_s2 = inlined_call_operand.hbm [shape: f32[128,128], index: 2, kind: input, shape index: {}]   ;;  %s1874_s3 = inlined_call_operand.vmem [shape: f32[1,128], index: 3, kind: input, shape index: {}]   ;;  %s1875_s4 = inlined_call_operand.hbm [shape: f32[128,128], index: 4, kind: input, shape index: {}]   ;;  %s1876_s5 = inlined_call_operand.vmem [shape: f32[1,128], index: 5, kind: input, shape index: {}]   ;;  %s1877_s6 = inlined_call_operand.hbm [shape: f32[128,128], index: 6, kind: input, shape index: {}]   ;;  %s1878_s7 = inlined_call_operand.vmem [shape: f32[1,128], index: 7, kind: input, shape index: {}]   ;;  %s1879_s8 = inlined_call_operand.hbm [shape: f32[64,128], index: 8, kind: output, shape index: {}]  }
   0x1   :  { %14 = vsyncpa [#allocation3], 0 }
   0x2   :  { %16 = vsyncpa [#allocation3 + $0x1], 0 }
   0x3   :  { %17 = vsyncpa [#allocation8], 0 }
   0x4   :  { %18 = vsyncpa [#allocation11], 0 }
   0x5   :  { %19 = vsyncpa [#allocation4], 0 }
   0x6   :  { %21 = vsyncpa [#allocation4 + $0x1], 0  ;;  %s1548_s27 = smov 0   ;;  %s1550_s28 = smov 0  }
   0x7   :  { %s1552_s29 = smov 0   ;;  %s1554_s30 = smov 0  }
   0x8 LB: > { %1885 = sst [smem:[#allocation18_spill]] %s1479_s27  ;;  %s1569_s9 = sadd.s32 4294967295, %s1491_s30   ;;  %s1491_s30 = sphi %s1554_s30, %s1910_s30   ;;  %s1487_s29 = sphi %s1552_s29, %s1909_s29   ;;  %s1483_s28 = sphi %s1550_s28, %s1908_s28   ;;  %s1479_s27 = sphi %s1548_s27, %s1907_s27  }
   0x9   : > { %s880_s10 = sadd.s32 4294967294, %s1491_s30   ;;  %p68_p0 = scmp.ne.s32.totalorder %s1483_s28, %s1479_s27 }
   0xa   : > { %p1880_p1 = scmp.eq.s32.totalorder %s1569_s9, 0  ;;  %p224_p3 = scmp.eq.s32.totalorder %s880_s10, 1 }
   0xb   : > { %p881_p5 = scmp.ge.s32.totalorder %s1491_s30, 1  ;;  %p231_p7 = scmp.lt.s32.totalorder %s1491_s30, 3 }
   0xc   : > { %p1578_p4 = por %p1880_p1, %p68_p0  ;;  %p1583_p6 = por %p224_p3, %p68_p0 }
   0xd   : > { %p1588_p8 = pnand %p881_p5, %p231_p7  ;;  %s1493_s14 = smov [#allocation7]  }
   0xe   : > { %s1886_s11 = scalar_select %p1578_p4, 1, 0 }
   0xf   : > { %s1887_s12 = scalar_select %p1583_p6, 1, 0 }
  0x10   : > { %s1889_s13 = scalar_select %p1588_p8, 1, 0 }
  0x11   : > { %1888 = sst [smem:[#allocation19_spill]] %s1887_s12  ;;  %s252_s15 = sshll.u32 %s1493_s14, 4  ;;  %s1592_s15 = int_to_ptr.vmem [resolvable:$true] %s252_s15 }
  0x12   : > { %p1215_p9 = pneg %p1588_p8  ;;  %s1494_s17 = smov [#allocation9]  }
  0x13   : > { %s268_s18 = sshll.u32 %s1494_s17, 4  ;;  %s1286_s21 = scalar_lea.hbm %s1873_s2, 2048  ;;  %s1603_s18 = int_to_ptr.vmem [resolvable:$true] %s268_s18 }
  0x14   : > { %p1599_p11 = pnand %p1215_p9, %p1880_p1  ;;  %p1287_p12 = scmp.ne.s32.totalorder %s1873_s2, %s1286_s21 }
  0x15   : > { %p1293_p5 = scmp.lt.u32.totalorder %s1286_s21, %s1873_s2 }
  0x16   : > { %p1613_p13 = pneg %p1599_p11 }
  0x18   : > { %p1289_p0 = pnand %p1613_p13, %p1287_p12 }
  0x1a   : > { %p1290_p3 = pneg %p1289_p0 }
  0x1c   : > { %p1295_p7 = pnand %p1293_p5, %p1290_p3 }
  0x1e   : > { %1298 = shalt.err (!%p1295_p7)
}
  0x1f   : > { %s1299_s10 = scalar_lea.vmem %s1592_s15, 2048  ;;  %p1307_p2 = scmp.lt.s32.totalorder %s1592_s15, %s1592_s15 }
  0x20   : > { %p1300_p9 = scmp.ne.s32.totalorder %s1592_s15, %s1299_s10  ;;  %p1308_p6 = scmp.lt.s32.totalorder %s1299_s10, %s1299_s10 }
  0x22   : > { %p1302_p10 = pnand %p1300_p9, %p1613_p13  ;;  %p1309_p12 = por %p1308_p6, %p1307_p2 }
  0x24   : > { %p1303_p1 = pneg %p1302_p10 }
  0x26   : > { %p1310_p0 = pnand %p1309_p12, %p1303_p1 }
  0x28   : > { %1313 = shalt.err (!%p1310_p0)
}
  0x29   : > { %s1495_s14 = smov 128   ;;  %s1496_s17 = smov 8  }
  0x2a   : > { %1221 = dma.hbm_to_vmem [thread:$0]  (!%p1599_p11), %s1873_s2, 2048, %s1592_s15, [#allocation8], %s1495_s14, %s1495_s14, %s1496_s17  }
  0x2b   : > { %s1314_s23 = scalar_lea.hbm %s1871_s0, 16 }
  0x2c   : > { %p1315_p1 = scmp.ne.s32.totalorder %s1871_s0, %s1314_s23  ;;  %p1321_p10 = scmp.lt.u32.totalorder %s1314_s23, %s1871_s0 }
  0x2e   : > { %p1317_p2 = pnand %p1315_p1, %p1613_p13 }
  0x30   : > { %p1318_p6 = pneg %p1317_p2 }
  0x32   : > { %p1323_p3 = pnand %p1321_p10, %p1318_p6 }
  0x34   : > { %1326 = shalt.err (!%p1323_p3)
}
  0x35   : > { %s1497_s27 = smov [#allocation2]   ;;  %s1327_s22 = scalar_lea.hbm %s1875_s4, 2048 }
  0x36   : > { %1218 = dma.hbm_to_smem (!%p1599_p11), %s1871_s0, 16, %s1497_s27, [#allocation5]  }
  0x37   : > { %p1328_p5 = scmp.ne.s32.totalorder %s1875_s4, %s1327_s22  ;;  %p1334_p12 = scmp.lt.u32.totalorder %s1327_s22, %s1875_s4 }
  0x39   : > { %p1330_p7 = pnand %p1328_p5, %p1613_p13 }
  0x3b   : > { %p1331_p9 = pneg %p1330_p7 }
  0x3d   : > { %p1336_p0 = pnand %p1334_p12, %p1331_p9 }
  0x3f   : > { %1339 = shalt.err (!%p1336_p0)
}
  0x40   : > { %s1340_s27 = scalar_lea.vmem %s1603_s18, 2048  ;;  %p1348_p10 = scmp.lt.s32.totalorder %s1603_s18, %s1603_s18 }
  0x41   : > { %p1341_p1 = scmp.ne.s32.totalorder %s1603_s18, %s1340_s27  ;;  %p1349_p3 = scmp.lt.s32.totalorder %s1340_s27, %s1340_s27 }
  0x43   : > { %p1343_p2 = pnand %p1341_p1, %p1613_p13  ;;  %p1350_p5 = por %p1349_p3, %p1348_p10 }
  0x45   : > { %p1344_p6 = pneg %p1343_p2 }
  0x47   : > { %p1351_p7 = pnand %p1350_p5, %p1344_p6 }
  0x49   : > { %1354 = shalt.err (!%p1351_p7)
}
  0x4a   : > { %1224 = dma.hbm_to_vmem [thread:$0]  (!%p1599_p11), %s1875_s4, 2048, %s1603_s18, [#allocation8], %s1495_s14, %s1495_s14, %s1496_s17  }
  0x4b   : > { %s1498_s19 = smov [#allocation10]   ;;  %s1355_s25 = scalar_lea.hbm %s1877_s6, 2048 }
  0x4c   : > { %s284_s20 = sshll.u32 %s1498_s19, 4  ;;  %p1356_p9 = scmp.ne.s32.totalorder %s1877_s6, %s1355_s25  ;;  %s285_s20 = int_to_ptr.vmem [resolvable:$true] %s284_s20 }
  0x4d   : > { %p1362_p1 = scmp.lt.u32.totalorder %s1355_s25, %s1877_s6 }
  0x4e   : > { %p1358_p12 = pnand %p1356_p9, %p1613_p13 }
  0x50   : > { %p1359_p0 = pneg %p1358_p12 }
  0x52   : > { %p1364_p2 = pnand %p1362_p1, %p1359_p0 }
  0x54   : > { %1367 = shalt.err (!%p1364_p2)
}
  0x55   : > { %s1368_s18 = scalar_lea.vmem %s285_s20, 2048  ;;  %p1376_p5 = scmp.lt.s32.totalorder %s285_s20, %s285_s20 }
  0x56   : > { %p1369_p6 = scmp.ne.s32.totalorder %s285_s20, %s1368_s18  ;;  %p1377_p7 = scmp.lt.s32.totalorder %s1368_s18, %s1368_s18 }
  0x58   : > { %p1371_p10 = pnand %p1369_p6, %p1613_p13  ;;  %p1378_p4 = por %p1377_p7, %p1376_p5 }
  0x5a   : > { %p1372_p3 = pneg %p1371_p10 }
  0x5c   : > { %p1379_p8 = pnand %p1378_p4, %p1372_p3 }
  0x5e   : > { %1382 = shalt.err (!%p1379_p8)
}
  0x5f   : > { %1227 = dma.hbm_to_vmem [thread:$0]  (!%p1599_p11), %s1877_s6, 2048, %s285_s20, [#allocation11], %s1495_s14, %s1495_s14, %s1496_s17  }
  0x60   : > { %s1701_s24 = sadd.s32 1, %s1491_s30   ;;  %s55_s16 = sadd.s32 1, %s1487_s29 }
  0x61   : > { %s52_s19 = ssub.s32 %s1491_s30, %s1701_s24  ;;  %p62_p4 = scmp.ne.s32.totalorder %s1487_s29, %s1483_s28 }
  0x62   : > { %p53_p8 = scmp.eq.s32.totalorder %s52_s19, 0  ;;  %p63_p13 = scmp.eq.s32.totalorder %s1491_s30, 0 }
  0x63   : > { %p1892_p9 = scmp.eq.s32.totalorder %s1569_s9, 1  ;;  %p1240_p0 = scmp.lt.s32.totalorder %s1491_s30, 2 }
  0x64   : > { %s1717_s22 = scalar_select %p53_p8, %s1487_s29, %s55_s16  }
  0x65   : > { %p1711_p12 = por %p1892_p9, %p62_p4  ;;  %p64_p1 = por %p63_p13, %p62_p4 }
  0x66   : > { %s301_s25 = sand.u32 1, %s1487_s29   ;;  %s907_s20 = sshll.u32 %s1491_s30, 9 }
  0x67   : > { %s887_s26 = sshll.u32 %s301_s25, 5  ;;  %s1724_s27 = scalar_lea.hbm %s1872_s1, %s907_s20 }
  0x68   : > { %s305_s18 = scalar_lea.vmem [#allocation6], %s887_s26  ;;  %p1728_p11 = pnand %p1240_p0, %p64_p1 }
  0x69   : > { %s312_s10 = sshll.u32 %s305_s18, 4  ;;  %s1732_s16 = scalar_lea.sflag [#allocation3], %s301_s25  ;;  %s1726_s10 = int_to_ptr.vmem [resolvable:$true] %s312_s10 }
  0x6a   : > { %s1383_s19 = scalar_lea.hbm %s1724_s27, 512  ;;  %p1385_p6 = pneg %p1728_p11 }
  0x6b   : > { %p1384_p2 = scmp.ne.s32.totalorder %s1724_s27, %s1383_s19  ;;  %s1388_s12 = scalar_lea.hbm %s1872_s1, 1024 }
  0x6c   : > { %p1389_p5 = scmp.lt.u32.totalorder %s1724_s27, %s1872_s1  ;;  %p1390_p7 = scmp.lt.u32.totalorder %s1388_s12, %s1383_s19 }
  0x6d   : > { %p1386_p10 = pnand %p1385_p6, %p1384_p2  ;;  %p1392_p8 = scmp.lt.u32.totalorder %s1383_s19, %s1724_s27 }
  0x6e   : > { %p1391_p4 = por %p1390_p7, %p1389_p5 }
  0x6f   : > { %p1387_p3 = pneg %p1386_p10 }
  0x70   : > { %p1393_p13 = por %p1392_p8, %p1391_p4 }
  0x72   : > { %p1394_p9 = pnand %p1393_p13, %p1387_p3 }
  0x74   : > { %1397 = shalt.err (!%p1394_p9)
}
  0x75   : > { %s1398_s25 = scalar_lea.vmem %s1726_s10, 512  ;;  %s1499_s26 = smov [#allocation6]  }
  0x76   : > { %p1399_p0 = scmp.ne.s32.totalorder %s1726_s10, %s1398_s25  ;;  %s1403_s20 = sshll.u32 %s1499_s26, 4  ;;  %s1404_s20 = int_to_ptr.vmem [resolvable:$false] %s1403_s20 }
  0x77   : > { %s1405_s23 = scalar_lea.vmem %s1404_s20, 1024  ;;  %p1406_p10 = scmp.lt.s32.totalorder %s1726_s10, %s1404_s20 }
  0x78   : > { %p1401_p1 = pnand %p1399_p0, %p1385_p6  ;;  %p1407_p5 = scmp.lt.s32.totalorder %s1405_s23, %s1398_s25 }
  0x7a   : > { %p1402_p2 = pneg %p1401_p1  ;;  %p1408_p7 = por %p1407_p5, %p1406_p10 }
  0x7c   : > { %p1409_p4 = pnand %p1408_p7, %p1402_p2 }
  0x7e   : > { %1412 = shalt.err (!%p1409_p4)
}
  0x7f   : > { %1231 = dma.hbm_to_vmem [thread:$0]  (!%p1728_p11), %s1724_s27, 512, %s1726_s10, %s1732_s16, %s1495_s14, %s1495_s14, %s1496_s17  }
  0x80   : > { %p1895_p6 = scmp.ne.s32.totalorder %s1889_s13, 0 }
  0x81   : > { %p1896_p3 = scmp.eq.s32.totalorder (!%p1895_p6), %s1569_s9, 0 }
  0x82   : > { %324 = sbr.rel (%p1895_p6) target bundleno = 860 (0x35c), region = 52 }
  0x89   : > { %1458 = dma.done.wait (%p1896_p3), [#allocation5], 16   ;;  %p1897_p8 = pmov %p1896_p3 }
  0x8a   : > { %s1770_s19 = sand.u32 1, %s1483_s28   ;;  %p1898_p11 = scmp.ne.s32.totalorder %s1886_s11, 0 }
  0x8b   : > { %1460 = vsyncadd (%p1897_p8), [#allocation5], 4294967280  ;;  %s892_s15 = sshll.u32 %s1770_s19, 5  ;;  %s331_s12 = scalar_lea.sflag [#allocation3], %s1770_s19 }
  0x8c   : > { %s1776_s14 = scalar_lea.vmem [#allocation6], %s892_s15 }
  0x8d   : > { %1462 = dma.done.wait (%p1898_p11), %s331_s12, 512  }
  0x8e   : > { %1464 = vsyncadd (%p1898_p11), %s331_s12, 4294966784  ;;  %p1899_p13 = pmov %p1896_p3 }
  0x8f   : > { %p1900_p9 = pmov %p1896_p3 }
  0x90   : > { %1466 = dma.done.wait (%p1899_p13), [#allocation8], 4096  }
  0x91   : > { %1468 = vsyncadd (%p1900_p9), [#allocation8], 4294963200  ;;  %p1901_p0 = pmov %p1896_p3 }
  0x93   : > { %1470 = dma.done.wait (%p1901_p0), [#allocation11], 2048   ;;  %p1902_p1 = pmov %p1901_p0 }
  0x95   : > { %1472 = vsyncadd (%p1902_p1), [#allocation11], 4294965248 }
  0x96   : > { %351 = sfence }
  0x97   : > { %v389_v0 = vld [vmem:[#allocation7] sm:$0xff]  ;;  %v390_v1 = vld [vmem:[#allocation7 + $0x8] sm:$0xff]  ;;  %v391_v2 = vld [vmem:[#allocation7 + $0x10] sm:$0xff]  ;;  %s382_s11 = sld [smem:[#allocation2]]  ;;  %s897_s27 = sld [smem:[#allocation2 + $0x1]] }
  0x98   : > { %v1083_v3 = vpack.c.bf16 %v390_v1, %v389_v0  ;;  %v392_v4 = vld [vmem:[#allocation7 + $0x18] sm:$0xff]  ;;  %v393_v6 = vld [vmem:[#allocation7 + $0x20] sm:$0xff]  ;;  %v394_v7 = vld [vmem:[#allocation7 + $0x28] sm:$0xff]  ;;  %s898_s18 = sld [smem:[#allocation2 + $0x2]]  ;;  %s379_s20 = scalar_lea.vmem [#allocation12], %s892_s15 }
  0x99   : > { %v1087_v5 = vpack.c.bf16 %v392_v4, %v391_v2  ;;  %v1091_v8 = vpack.c.bf16 %v394_v7, %v393_v6  ;;  %v1791_v9 = vld [vmem:[%s1776_s14] sm:$0xff]  ;;  %v395_v10 = vld [vmem:[#allocation7 + $0x30] sm:$0xff]  ;;  %v396_v11 = vld [vmem:[#allocation7 + $0x38] sm:$0xff]  ;;  %s766_s23 = sshll.u32 %s379_s20, 4  ;;  %s908_s12 = sshll.u32 %s1569_s9, 9  ;;  %s1822_s23 = int_to_ptr.vmem [resolvable:$true] %s766_s23 }
  0x9a   : > { %1084 = vmatprep.subr.bf16.mxu0 %v1083_v3  ;;  %1001 = vmatprep.mubr.f32.mxu0 %v1791_v9  ;;  %v510_v12 = vld [vmem:[#allocation9] sm:$0xff]  ;;  %v511_v13 = vld [vmem:[#allocation9 + $0x8] sm:$0xff]  ;;  %v512_v14 = vld [vmem:[#allocation9 + $0x10] sm:$0xff]  ;;  %v1095_v18 = vpack.c.bf16 %v396_v11, %v395_v10  ;;  %s753_s9 = scalar_lea.sflag [#allocation4], %s1770_s19  ;;  %s1413_s13 = scalar_lea.vmem %s1822_s23, 512 }
  0x9b   : > { %1086 = vmatpush3.bf16.msra.mxu0 %v1083_v3  ;;  %v513_v15 = vld [vmem:[#allocation9 + $0x18] sm:$0xff]  ;;  %v1115_v16 = vpack.c.bf16 %v511_v13, %v510_v12  ;;  %v514_v19 = vld [vmem:[#allocation9 + $0x20] sm:$0xff]  ;;  %v515_v20 = vld [vmem:[#allocation9 + $0x28] sm:$0xff]  ;;  %p1414_p2 = scmp.ne.s32.totalorder %s1822_s23, %s1413_s13  ;;  %s1500_s17 = smov [#allocation12]  }
  0x9c   : > { %1088 = vmatprep.subr.bf16.mxu0 %v1087_v5  ;;  %v1119_v17 = vpack.c.bf16 %v513_v15, %v512_v14  ;;  %v397_v21 = vld [vmem:[#allocation7 + $0x40] sm:$0xff]  ;;  %v398_v22 = vld [vmem:[#allocation7 + $0x48] sm:$0xff]  ;;  %v1123_v23 = vpack.c.bf16 %v515_v20, %v514_v19  ;;  %v516_v25 = vld [vmem:[#allocation9 + $0x30] sm:$0xff] }
  0x9d   : > { %1116 = vmatprep.subr.bf16.mxu1 %v1115_v16  ;;  %v1099_v24 = vpack.c.bf16 %v398_v22, %v397_v21  ;;  %v517_v26 = vld [vmem:[#allocation9 + $0x38] sm:$0xff]  ;;  %v399_v27 = vld [vmem:[#allocation7 + $0x50] sm:$0xff]  ;;  %v518_v31 = vld [vmem:[#allocation9 + $0x40] sm:$0xff]  ;;  %p1415_p10 = pnand %p1414_p2, %p1711_p12 }
  0x9e   : > { %1118 = vmatpush3.bf16.msra.mxu1 %v1115_v16  ;;  %v400_v28 = vld [vmem:[#allocation7 + $0x58] sm:$0xff]  ;;  %v1127_v29 = vpack.c.bf16 %v517_v26, %v516_v25  ;;  %v519_v32 = vld [vmem:[#allocation9 + $0x48] sm:$0xff]  ;;  %v401_v33 = vld [vmem:[#allocation7 + $0x60] sm:$0xff] }
  0x9f   : > { %1090 = vmatpush3.bf16.msra.mxu0 %v1087_v5  ;;  %1120 = vmatprep.subr.bf16.mxu1 %v1119_v17  ;;  %v1103_v30 = vpack.c.bf16 %v400_v28, %v399_v27  ;;  %v402_v34 = vld [vmem:[#allocation7 + $0x68] sm:$0xff]  ;;  %v1131_v35 = vpack.c.bf16 %v519_v32, %v518_v31  ;;  %v520_v37 = vld [vmem:[#allocation9 + $0x50] sm:$0xff]  ;;  %v521_v38 = vld [vmem:[#allocation9 + $0x58] sm:$0xff]  ;;  %p1416_p5 = pneg %p1415_p10 }
  0xa0   : > { %1092 = vmatprep.subr.bf16.mxu0 %v1091_v8  ;;  %v1107_v36 = vpack.c.bf16 %v402_v34, %v401_v33  ;;  %v403_v39 = vld [vmem:[#allocation7 + $0x70] sm:$0xff]  ;;  %v404_v40 = vld [vmem:[#allocation7 + $0x78] sm:$0xff]  ;;  %v1135_v41 = vpack.c.bf16 %v521_v38, %v520_v37  ;;  %v1795_v43 = vld [vmem:[%s1776_s14 + $0x8] sm:$0xff]  ;;  %v622_v33 = vstv %s897_s27  ;;  %s1417_s27 = sshll.u32 %s1500_s17, 4  ;;  %s1418_s27 = int_to_ptr.vmem [resolvable:$false] %s1417_s27 }
  0xa1   : > { %v1111_v42 = vpack.c.bf16 %v404_v40, %v403_v39  ;;  %v1798_v44 = vld [vmem:[%s1776_s14 + $0x10] sm:$0xff]  ;;  %v1803_v45 = vld [vmem:[%s1776_s14 + $0x18] sm:$0xff]  ;;  %v522_v46 = vld [vmem:[#allocation9 + $0x60] sm:$0xff]  ;;  %s1419_s10 = scalar_lea.vmem %s1418_s27, 1024  ;;  %p1420_p7 = scmp.lt.s32.totalorder %s1822_s23, %s1418_s27 }
  0xa2   : > { %1122 = vmatpush3.bf16.msra.mxu1 %v1119_v17  ;;  %v523_v47 = vld [vmem:[#allocation9 + $0x68] sm:$0xff]  ;;  %v524_v49 = vld [vmem:[#allocation9 + $0x70] sm:$0xff]  ;;  %v525_v50 = vld [vmem:[#allocation9 + $0x78] sm:$0xff]  ;;  %p1421_p4 = scmp.lt.s32.totalorder %s1419_s10, %s1413_s13 }
  0xa3   : > { %1094 = vmatpush3.bf16.msra.mxu0 %v1091_v8  ;;  %1124 = vmatprep.subr.bf16.mxu1 %v1123_v23  ;;  %v1139_v48 = vpack.c.bf16 %v523_v47, %v522_v46  ;;  %v1143_v51 = vpack.c.bf16 %v525_v50, %v524_v49  ;;  %v631_v52 = vld [vmem:[#allocation10] sm:$0xff]  ;;  %v632_v53 = vld [vmem:[#allocation10 + $0x8] sm:$0xff]  ;;  %v633_v54 = vld [vmem:[#allocation10 + $0x10] sm:$0xff]  ;;  %v501_v8 = vstv %s382_s11  ;;  %s1827_s11 = scalar_lea.hbm %s1879_s8, %s908_s12 }
  0xa4   : > { %1096 = vmatprep.subr.bf16.mxu0 %v1095_v18  ;;  %v1147_v55 = vpack.c.bf16 %v632_v53, %v631_v52  ;;  %v634_v56 = vld [vmem:[#allocation10 + $0x18] sm:$0xff]  ;;  %v635_v58 = vld [vmem:[#allocation10 + $0x20] sm:$0xff]  ;;  %v636_v59 = vld [vmem:[#allocation10 + $0x28] sm:$0xff]  ;;  %v739_v52 = vstv %s898_s18  ;;  %p1422_p6 = por %p1421_p4, %p1420_p7 }
  0xa5   : > { %v1151_v57 = vpack.c.bf16 %v634_v56, %v633_v54  ;;  %v1155_v60 = vpack.c.bf16 %v636_v59, %v635_v58  ;;  %v637_v61 = vld [vmem:[#allocation10 + $0x30] sm:$0xff]  ;;  %v638_v62 = vld [vmem:[#allocation10 + $0x38] sm:$0xff]  ;;  %v639_v0 = vld [vmem:[#allocation10 + $0x40] sm:$0xff]  ;;  %v741_v54 = vmul.f32 %v739_v52, %v1795_v43 }
  0xa6   : > { %1126 = vmatpush3.bf16.msra.mxu1 %v1123_v23  ;;  %v1159_v63 = vpack.c.bf16 %v638_v62, %v637_v61  ;;  %v640_v1 = vld [vmem:[#allocation10 + $0x48] sm:$0xff]  ;;  %v641_v3 = vld [vmem:[#allocation10 + $0x50] sm:$0xff]  ;;  %v642_v4 = vld [vmem:[#allocation10 + $0x58] sm:$0xff]  ;;  %v742_v62 = vmul.f32 %v739_v52, %v1798_v44  ;;  %p1423_p3 = pnand %p1422_p6, %p1416_p5 }
  0xa7   : > { %1098 = vmatpush3.bf16.msra.mxu0 %v1095_v18  ;;  %1128 = vmatprep.subr.bf16.mxu1 %v1127_v29  ;;  %v1163_v2 = vpack.c.bf16 %v640_v1, %v639_v0  ;;  %v1167_v5 = vpack.c.bf16 %v642_v4, %v641_v3  ;;  %v899_v6 = vld [vmem:[%s1874_s3] ss:$0 sm:$0xff]  ;;  %v644_v26 = vld [vmem:[#allocation10 + $0x68] sm:$0xff]  ;;  %v645_v28 = vld [vmem:[#allocation10 + $0x70] sm:$0xff] }
  0xa8   : > { %1100 = vmatprep.subr.bf16.mxu0 %v1099_v24  ;;  %v643_v25 = vld [vmem:[#allocation10 + $0x60] sm:$0xff] }
  0xa9   : > { %v1171_v27 = vpack.c.bf16 %v644_v26, %v643_v25  ;;  %v900_v31 = vld [vmem:[%s1876_s5] ss:$0 sm:$0xff] }
  0xaa   : > { %1130 = vmatpush3.bf16.msra.mxu1 %v1127_v29  ;;  %v646_v29 = vld [vmem:[#allocation10 + $0x78] sm:$0xff]  ;;  %v901_v53 = vld [vmem:[%s1878_s7] ss:$0 sm:$0xff] }
  0xab   : > { %1102 = vmatpush3.bf16.msra.mxu0 %v1099_v24  ;;  %1132 = vmatprep.subr.bf16.mxu1 %v1131_v35 }
  0xac   : > { %1104 = vmatprep.subr.bf16.mxu0 %v1103_v30 }
  0xae   : > { %1134 = vmatpush3.bf16.msra.mxu1 %v1131_v35 }
  0xaf   : > { %1106 = vmatpush3.bf16.msra.mxu0 %v1103_v30  ;;  %1136 = vmatprep.subr.bf16.mxu1 %v1135_v41  ;;  %v1175_v30 = vpack.c.bf16 %v646_v29, %v645_v28 }
  0xb0   : > { %1108 = vmatprep.subr.bf16.mxu0 %v1107_v36 }
  0xb2   : > { %1138 = vmatpush3.bf16.msra.mxu1 %v1135_v41 }
  0xb3   : > { %1110 = vmatpush3.bf16.msra.mxu0 %v1107_v36  ;;  %1140 = vmatprep.subr.bf16.mxu1 %v1139_v48 }
  0xb4   : > { %1112 = vmatprep.subr.bf16.mxu0 %v1111_v42 }
  0xb6   : > { %1142 = vmatpush3.bf16.msra.mxu1 %v1139_v48 }
  0xb7   : > { %1114 = vmatpush3.bf16.msra.mxu0 %v1111_v42  ;;  %1144 = vmatprep.subr.bf16.mxu1 %v1143_v51 }
  0xb8   : > { %1148 = vmatprep.subr.bf16.mxu0 %v1147_v55 }
  0xba   : > { %1002 = vmatmul.mubr.f32.vlgmr.msra.gmra.mrb[0].mxu0 %v1795_v43  ;;  %1146 = vmatpush3.bf16.msra.mxu1 %v1143_v51 }
  0xbb   : > { %1004 = vmatprep.mubr.f32.mxu0 %v1798_v44  ;;  %1179 = vmatprep.subr.bf16.mxu1 %v1147_v55 }
  0xbc   : > { %1150 = vmatpush3.bf16.msra.mxu0 %v1147_v55 }
  0xbd   : > { %1152 = vmatprep.subr.bf16.mxu0 %v1151_v57 }
  0xbe   : > { %1005 = vmatmul.mubr.f32.gmra.mrb[2].mxu0 %v1803_v45 }
  0xc0   : > { %1154 = vmatpush3.bf16.msra.mxu0 %v1151_v57 }
  0xc1   : > { %1156 = vmatprep.subr.bf16.mxu0 %v1155_v60 }
  0xc4   : > { %1158 = vmatpush3.bf16.msra.mxu0 %v1155_v60 }
  0xc5   : > { %1160 = vmatprep.subr.bf16.mxu0 %v1159_v63 }
  0xc8   : > { %1162 = vmatpush3.bf16.msra.mxu0 %v1159_v63 }
  0xc9   : > { %1164 = vmatprep.subr.bf16.mxu0 %v1163_v2 }
  0xcc   : > { %1166 = vmatpush3.bf16.msra.mxu0 %v1163_v2 }
  0xcd   : > { %1168 = vmatprep.subr.bf16.mxu0 %v1167_v5 }
  0xd0   : > { %1170 = vmatpush3.bf16.msra.mxu0 %v1167_v5 }
  0xd1   : > { %1172 = vmatprep.subr.bf16.mxu0 %v1171_v27 }
  0xd4   : > { %1174 = vmatpush3.bf16.msra.mxu0 %v1171_v27 }
  0xd5   : > { %1176 = vmatprep.subr.bf16.mxu0 %v1175_v30 }
  0xd8   : > { %1178 = vmatpush3.bf16.msra.mxu0 %v1175_v30 }
 0x18d   : > { %v1003_v7 = vpop.f32.mrb[0].mxu0 }
 0x18e   : > { %v484_v10 = vadd.f32 %v1003_v7, %v899_v6  ;;  %v478_v11 = vpop.f32.mrb[1].mxu0 }
 0x18f   : > { %v479_v12 = vadd.f32 %v899_v6, %v478_v11 }
 0x190   : > { %v503_v13 = vmul.f32 %v501_v8, %v484_v10  ;;  %vm498_vm1 = vcmp.gt.f32.partialorder %v484_v10, 0.0 }
 0x191   : > { %v1006_v14 = vpop.f32.mrb[2].mxu0  ;;  %vm497_vm0 = vcmp.gt.f32.partialorder %v479_v12, 0.0  ;;  %v502_v15 = vmul.f32 %v501_v8, %v479_v12 }
 0x192   : > { %v494_v16 = vadd.f32 %v1006_v14, %v899_v6  ;;  %v488_v17 = vpop.f32.mrb[3].mxu0  ;;  %v507_v21 = vsel %vm498_vm1, %v484_v10, %v503_v13 }
 0x193   : > { %v489_v18 = vadd.f32 %v899_v6, %v488_v17  ;;  %v506_v19 = vsel %vm497_vm0, %v479_v12, %v502_v15 }
 0x194   : > { %v505_v20 = vmul.f32 %v501_v8, %v494_v16  ;;  %1039 = vmatprep.mubr.f32.mxu1 %v506_v19  ;;  %vm500_vm3 = vcmp.gt.f32.partialorder %v494_v16, 0.0 }
 0x195   : > { %v504_v22 = vmul.f32 %v501_v8, %v489_v18  ;;  %1040 = vmatmul.mubr.f32.vlgmr.msra.gmra.mrb[0].mxu1 %v507_v21  ;;  %vm499_vm2 = vcmp.gt.f32.partialorder %v489_v18, 0.0 }
 0x196   : > { %1187 = vmatpush3.bf16.msra.mxu1 %v1147_v55  ;;  %v509_v24 = vsel %vm500_vm3, %v494_v16, %v505_v20  ;;  %v740_v55 = vmul.f32 %v739_v52, %v1791_v9 }
 0x197   : > { %v508_v23 = vsel %vm499_vm2, %v489_v18, %v504_v22  ;;  %1180 = vmatprep.subr.bf16.mxu1 %v1151_v57 }
 0x198   : > { %1042 = vmatprep.mubr.f32.mxu1 %v508_v23 }
 0x199   : > { %1043 = vmatmul.mubr.f32.gmra.mrb[2].mxu1 %v509_v24 }
 0x19a   : > { %1188 = vmatpush3.bf16.msra.mxu1 %v1151_v57 }
 0x19b   : > { %1181 = vmatprep.subr.bf16.mxu1 %v1155_v60 }
 0x19e   : > { %1189 = vmatpush3.bf16.msra.mxu1 %v1155_v60  ;;  %v743_v60 = vmul.f32 %v739_v52, %v1803_v45 }
 0x19f   : > { %1182 = vmatprep.subr.bf16.mxu1 %v1159_v63 }
 0x1a2   : > { %1190 = vmatpush3.bf16.msra.mxu1 %v1159_v63 }
 0x1a3   : > { %1183 = vmatprep.subr.bf16.mxu1 %v1163_v2 }
 0x1a6   : > { %1191 = vmatpush3.bf16.msra.mxu1 %v1163_v2 }
 0x1a7   : > { %1184 = vmatprep.subr.bf16.mxu1 %v1167_v5 }
 0x1aa   : > { %1192 = vmatpush3.bf16.msra.mxu1 %v1167_v5 }
 0x1ab   : > { %1185 = vmatprep.subr.bf16.mxu1 %v1171_v27 }
 0x1ae   : > { %1193 = vmatpush3.bf16.msra.mxu1 %v1171_v27 }
 0x1af   : > { %1186 = vmatprep.subr.bf16.mxu1 %v1175_v30 }
 0x1b2   : > { %1194 = vmatpush3.bf16.msra.mxu1 %v1175_v30 }
 0x268   : > { %v1041_v32 = vpop.f32.mrb[0].mxu1 }
 0x269   : > { %v605_v34 = vadd.f32 %v1041_v32, %v900_v31  ;;  %v599_v35 = vpop.f32.mrb[1].mxu1 }
 0x26a   : > { %v600_v36 = vadd.f32 %v900_v31, %v599_v35 }
 0x26b   : > { %v624_v37 = vmul.f32 %v622_v33, %v605_v34  ;;  %vm619_vm4 = vcmp.gt.f32.partialorder %v605_v34, 0.0 }
 0x26c   : > { %v623_v38 = vmul.f32 %v622_v33, %v600_v36  ;;  %v1044_v39 = vpop.f32.mrb[2].mxu1  ;;  %vm618_vm5 = vcmp.gt.f32.partialorder %v600_v36, 0.0 }
 0x26d   : > { %v615_v40 = vadd.f32 %v1044_v39, %v900_v31  ;;  %v609_v41 = vpop.f32.mrb[3].mxu1  ;;  %v628_v47 = vsel %vm619_vm4, %v605_v34, %v624_v37 }
 0x26e   : > { %v610_v42 = vadd.f32 %v900_v31, %v609_v41  ;;  %v627_v46 = vsel %vm618_vm5, %v600_v36, %v623_v38 }
 0x26f   : > { %v626_v48 = vmul.f32 %v622_v33, %v615_v40  ;;  %1077 = vmatprep.mubr.f32.mxu0 %v627_v46  ;;  %vm621_vm6 = vcmp.gt.f32.partialorder %v615_v40, 0.0 }
 0x270   : > { %v625_v49 = vmul.f32 %v622_v33, %v610_v42  ;;  %1078 = vmatmul.mubr.f32.vlgmr.msra.gmra.mrb[4].mxu0 %v628_v47  ;;  %vm620_vm7 = vcmp.gt.f32.partialorder %v610_v42, 0.0 }
 0x271   : > { %v630_v51 = vsel %vm621_vm6, %v615_v40, %v626_v48 }
 0x272   : > { %v629_v50 = vsel %vm620_vm7, %v610_v42, %v625_v49 }
 0x273   : > { %1080 = vmatprep.mubr.f32.mxu1 %v629_v50 }
 0x274   : > { %1081 = vmatmul.mubr.f32.vlgmr.msra.gmra.mrb[4].mxu1 %v630_v51 }
 0x343   : > { %v1079_v56 = vpop.f32.mrb[4].mxu0 }
 0x344   : > { %v726_v57 = vadd.f32 %v1079_v56, %v901_v53  ;;  %v720_v58 = vpop.f32.mrb[5].mxu0 }
 0x345   : > { %v721_v59 = vadd.f32 %v901_v53, %v720_v58 }
 0x346   : > { %v745_v61 = vadd.f32 %v741_v54, %v726_v57 }
 0x347   : > { %v744_v63 = vadd.f32 %v740_v55, %v721_v59  ;;  %v1082_v0 = vpop.f32.mrb[4].mxu1 }
 0x348   : > { %749 = vst [vmem:[%s379_s20 + $0x8] sm:$0xff] %v745_v61  ;;  %v736_v43 = vadd.f32 %v1082_v0, %v901_v53  ;;  %v730_v9 = vpop.f32.mrb[5].mxu1 }
 0x349   : > { %748 = vst [vmem:[%s379_s20] sm:$0xff] %v744_v63  ;;  %v731_v45 = vadd.f32 %v901_v53, %v730_v9 }
 0x34a   : > { %v747_v1 = vadd.f32 %v743_v60, %v736_v43 }
 0x34b   : > { %v746_v44 = vadd.f32 %v742_v62, %v731_v45 }
 0x34c   : > { %751 = vst [vmem:[%s379_s20 + $0x18] sm:$0xff] %v747_v1 }
 0x34d   : > { %750 = vst [vmem:[%s379_s20 + $0x10] sm:$0xff] %v746_v44 }
 0x34e   : > { %1426 = shalt.err (!%p1423_p3)
}
 0x34f   : > { %s1427_s16 = scalar_lea.hbm %s1827_s11, 512  ;;  %s1431_s26 = scalar_lea.hbm %s1879_s8, 1024 }
 0x350   : > { %p1428_p8 = scmp.ne.s32.totalorder %s1827_s11, %s1427_s16  ;;  %p1432_p9 = scmp.lt.u32.totalorder %s1827_s11, %s1879_s8 }
 0x351   : > { %p1433_p0 = scmp.lt.u32.totalorder %s1431_s26, %s1427_s16  ;;  %p1435_p2 = scmp.lt.u32.totalorder %s1427_s16, %s1827_s11 }
 0x352   : > { %p1429_p11 = pnand %p1428_p8, %p1711_p12 }
 0x353   : > { %p1434_p1 = por %p1433_p0, %p1432_p9 }
 0x354   : > { %p1430_p13 = pneg %p1429_p11 }
 0x355   : > { %p1436_p10 = por %p1435_p2, %p1434_p1 }
 0x357   : > { %p1437_p5 = pnand %p1436_p10, %p1430_p13 }
 0x359   : > { %1440 = shalt.err (!%p1437_p5)
}
 0x35a   : > { %s1501_s15 = smov 128   ;;  %s1502_s14 = smov 8  }
 0x35b   : > { %1213 = dma.vmem_to_hbm [thread:$0]  (%p1711_p12), %s1822_s23, 512, %s1827_s11, %s753_s9, %s1501_s15, %s1501_s15, %s1502_s14  }
 0x35c PF: > { %s1903_s13 = sld [smem:[#allocation18_spill]]  ;;  %s1904_s17 = sld [smem:[#allocation19_spill]] }
 0x35d   : > { %p1906_p4 = scmp.ge.s32.totalorder %s1491_s30, 2 }
 0x362   : > { %s781_s27 = sand.u32 1, %s1903_s13   ;;  %p1905_p7 = scmp.ne.s32.totalorder %s1904_s17, 0 }
 0x363   : > { %s782_s10 = scalar_lea.sflag [#allocation4], %s781_s27 }
 0x364   : > { %p1233_p6 = pnand %p1906_p4, %p1905_p7 }
 0x366   : > { %1474 = dma.done.wait (!%p1233_p6), %s782_s10, 512  }
 0x367   : > { %1476 = vsyncadd (!%p1233_p6), %s782_s10, 4294966784  ;;  %p24_p3 = scmp.ge.s32.totalorder %s1701_s24, 4   ;;  %s1907_s27 = smov %s1483_s28 }
 0x368   : > { %s1908_s28 = smov %s1487_s29  ;;  %s1909_s29 = smov %s1717_s22 }
 0x369   : > { %s1910_s30 = smov %s1701_s24  ;;  %26 = sbr.rel (!%p24_p3) target bundleno = 8 (0x8), region = 114 }
 0x370   :  { %787 = vsyncpa [#allocation3], 1 }
 0x371   :  { %789 = vsyncpa [#allocation3 + $0x1], 1 }
 0x372   :  { %790 = vsyncpa [#allocation8], 1 }
 0x373   :  { %791 = vsyncpa [#allocation11], 1 }
 0x374   :  { %792 = vsyncpa [#allocation4], 1 }
 0x375   :  { %794 = vsyncpa [#allocation4 + $0x1], 1 }
 0x376   :  { %795 = vsyncpa [#allocation5], 1 }
 0x377   :  { %797 = vsyncpa [#allocation5 + $0x1], 1 }

</bundles_post_ra>
